<compile_context>
chip_gen: v6e
topology: v6e:2x2x1
jax: 0.10.0
libtpu: 0.0.40
codegen_flags: <defaults>
</compile_context>

<pallas_src>
import functools

import jax
import jax.numpy as jnp
from jax import lax
from jax.experimental import pallas as pl
from jax.experimental.pallas import tpu as pltpu


def _round_up(v, m):
    return ((v + m - 1) // m) * m


def _conv_pool_matrix(w, hin, win):
    """Build M (Cin*Hin*Win, 4, Cout*Hp*Wp) with
       (x_flat @ M[:, d, :])[b, co*Hp*Wp + oh*Wp + ow]
         == VALID conv(x, w)[b, co, 2*oh + dh, 2*ow + dw],  d = dh*2 + dw.
    Pure weight-side preprocessing (a couple of small gathers), no activation glue.
    """
    cout, cin, kh_, kw_ = w.shape
    ho, wo = hin - kh_ + 1, win - kw_ + 1
    hp, wp = ho // 2, wo // 2
    ih = jnp.arange(hin)[:, None, None]
    oh = jnp.arange(hp)[None, :, None]
    dh = jnp.arange(2)[None, None, :]
    rh = ih - (2 * oh + dh)                              # (hin, hp, 2) kernel row index
    iw = jnp.arange(win)[:, None, None]
    ow = jnp.arange(wp)[None, :, None]
    dw = jnp.arange(2)[None, None, :]
    rw = iw - (2 * ow + dw)                              # (win, wp, 2) kernel col index
    vh = (rh >= 0) & (rh < kh_)
    vw = (rw >= 0) & (rw < kw_)
    m = w[:, :, jnp.clip(rh, 0, kh_ - 1), :]             # (cout, cin, hin, hp, 2, kw_)
    m = m[..., jnp.clip(rw, 0, kw_ - 1)]                 # (cout, cin, hin, hp, 2, win, wp, 2)
    valid = vh[:, :, :, None, None, None] & vw[None, None, None, :, :, :]
    m = m * valid[None, None].astype(w.dtype)
    # axes [cout, cin, ih, oh, dh, iw, ow, dw] -> [cin, ih, iw, dh, dw, cout, oh, ow]
    m = m.transpose(1, 2, 5, 4, 7, 0, 3, 6)
    return m.reshape(cin * hin * win, 4, cout * hp * wp)


def _fused_mnist_kernel(x_ref, w1_ref, b1_ref, w2_ref, b2_ref,
                        wf1_ref, bf1_ref, wf2_ref, bf2_ref, o_ref, *, n_classes):
    """Entire forward pass in one kernel: 4 MXU matmuls + VPU max/relu/softmax."""
    # ---- stage 1: conv1 -> max_pool2d(2) -> relu  (one matmul, lane-block max)
    n1 = w1_ref.shape[1] // 4
    z1 = jnp.dot(x_ref[...], w1_ref[...], preferred_element_type=jnp.float32)
    h1 = jnp.maximum(jnp.maximum(z1[:, 0 * n1:1 * n1], z1[:, 1 * n1:2 * n1]),
                     jnp.maximum(z1[:, 2 * n1:3 * n1], z1[:, 3 * n1:4 * n1]))
    h1 = jnp.maximum(h1 + b1_ref[...], 0.0)        # bias constant over pool window

    # ---- stage 2: conv2 -> max_pool2d(2) -> relu
    # TODO(synk): Dropout2d is identity at inference; channel dropout not implemented.
    n2 = w2_ref.shape[1] // 4
    z2 = jnp.dot(h1, w2_ref[...], preferred_element_type=jnp.float32)
    h2 = jnp.maximum(jnp.maximum(z2[:, 0 * n2:1 * n2], z2[:, 1 * n2:2 * n2]),
                     jnp.maximum(z2[:, 2 * n2:3 * n2], z2[:, 3 * n2:4 * n2]))
    feat = jnp.maximum(h2 + b2_ref[...], 0.0)      # == torch x.view(-1, k) in lanes [0, k)

    # ---- fc1 -> relu -> (dropout: identity at inference) -> fc2 -> softmax(dim=1)
    # TODO(synk): functional.dropout is identity at inference; training-mode masking
    # is not implemented here.
    h = jnp.dot(feat, wf1_ref[...], preferred_element_type=jnp.float32) + bf1_ref[...]
    h = jnp.maximum(h, 0.0)
    logits = jnp.dot(h, wf2_ref[...], preferred_element_type=jnp.float32) + bf2_ref[...]
    lane = lax.broadcasted_iota(jnp.int32, logits.shape, 1)
    logits = jnp.where(lane < n_classes, logits, -1e30)   # keep padded lanes out of softmax
    m = jnp.max(logits, axis=-1, keepdims=True)
    e = jnp.exp(logits - m)
    o_ref[...] = e / jnp.sum(e, axis=-1, keepdims=True)


def forward(x, params):
    w_c1, b_c1, w_c2, b_c2, w_f1, b_f1, w_f2, b_f2 = params
    B, Cin, H, W = x.shape
    C1, C2 = w_c1.shape[0], w_c2.shape[0]
    Hp1, Wp1 = (H - 4) // 2, (W - 4) // 2          # int((H - 5 + 1) / 2)
    Hp2, Wp2 = (Hp1 - 4) // 2, (Wp1 - 4) // 2
    if Hp2 < 1 or Wp2 < 1:
        raise ValueError("Input spatial dims too small for this architecture (need >= 16x16).")
    n1, n2 = C1 * Hp1 * Wp1, C2 * Hp2 * Wp2        # n2 == torch `self.k`
    nh, ncls = w_f1.shape[1], w_f2.shape[1]
    K = Cin * H * W
    BP, KP = _round_up(B, 8), _round_up(K, 128)
    N1, N2 = _round_up(n1, 128), _round_up(n2, 128)
    NH, NC = _round_up(nh, 128), _round_up(ncls, 128)

    # ---- weight-side preprocessing (tiny, O(weights); no per-activation glue) ----
    m1 = _conv_pool_matrix(w_c1, H, W)                                        # (K, 4, n1)
    w1 = jnp.pad(m1, ((0, KP - K), (0, 0), (0, N1 - n1))).reshape(KP, 4 * N1)
    b1 = jnp.pad(jnp.repeat(b_c1, Hp1 * Wp1), (0, N1 - n1)).reshape(1, N1)
    m2 = _conv_pool_matrix(w_c2, Hp1, Wp1)                                    # (n1, 4, n2)
    w2 = jnp.pad(m2, ((0, N1 - n1), (0, 0), (0, N2 - n2))).reshape(N1, 4 * N2)
    b2 = jnp.pad(jnp.repeat(b_c2, Hp2 * Wp2), (0, N2 - n2)).reshape(1, N2)
    wf1 = jnp.pad(w_f1, ((0, N2 - n2), (0, NH - nh)))
    bf1 = jnp.pad(b_f1, (0, NH - nh)).reshape(1, NH)
    wf2 = jnp.pad(w_f2, ((0, NH - nh), (0, NC - ncls)))
    bf2 = jnp.pad(b_f2, (0, NC - ncls)).reshape(1, NC)

    # ---- activation-side glue: one reshape + pad to an (8,128)-aligned tile ----
    x2d = jnp.pad(x.reshape(B, K), ((0, BP - B), (0, KP - K)))

    out = pl.pallas_call(
        functools.partial(_fused_mnist_kernel, n_classes=ncls),
        out_shape=jax.ShapeDtypeStruct((BP, NC), jnp.float32),
    )(x2d, w1, b1, w2, b2, wf1, bf1, wf2, bf2)
    return out[:B, :ncls]


def reference_forward(x, params):
    """Pure-JAX reference of the PyTorch forward (eval mode)."""
    w_c1, b_c1, w_c2, b_c2, w_f1, b_f1, w_f2, b_f2 = params

    def conv(a, w, b):
        y = lax.conv_general_dilated(a, w, (1, 1), 'VALID',
                                     dimension_numbers=('NCHW', 'OIHW', 'NCHW'))
        return y + b.reshape(1, -1, 1, 1)

    def pool(a):
        return lax.reduce_window(a, -jnp.inf, lax.max,
                                 (1, 1, 2, 2), (1, 1, 2, 2), 'VALID')

    y = jnp.maximum(pool(conv(x, w_c1, b_c1)), 0.0)
    y = jnp.maximum(pool(conv(y, w_c2, b_c2)), 0.0)
    feat = y.reshape(y.shape[0], -1)
    h = jnp.maximum(feat @ w_f1 + b_f1, 0.0)
    logits = h @ w_f2 + b_f2
    return jax.nn.softmax(logits, axis=1)


if __name__ == "__main__":
    B, H, W = 2, 16, 16                     # input is (B, 1, H, W), Conv2d(1, 10, 5)
    h1, w1 = (H - 4) // 2, (W - 4) // 2     # int((H - 5 + 1) / 2)
    h2, w2 = (h1 - 4) // 2, (w1 - 4) // 2
    kdim = 20 * h2 * w2                     # flattened feature size

    key = jax.random.PRNGKey(0)
    ks = jax.random.split(key, 9)

    def uinit(k, shape, fan_in):
        bound = 1.0 / (float(fan_in) ** 0.5)
        return jax.random.uniform(k, shape, jnp.float32, -bound, bound)

    params = (
        uinit(ks[0], (10, 1, 5, 5), 25),    uinit(ks[1], (10,), 25),     # conv1
        uinit(ks[2], (20, 10, 5, 5), 250),  uinit(ks[3], (20,), 250),    # conv2
        uinit(ks[4], (kdim, 60), kdim),     uinit(ks[5], (60,), kdim),   # fc1
        uinit(ks[6], (60, 10), 60),         uinit(ks[7], (10,), 60),     # fc2
    )
    x = jax.random.normal(ks[8], (B, 1, H, W), jnp.float32)

    out = jax.block_until_ready(jax.jit(forward)(x, params))
    assert out.shape == (B, 10)
    assert bool(jnp.all(jnp.abs(jnp.sum(out, axis=1) - 1.0) < 1e-4))

    ref = reference_forward(x, params)
    assert bool(jnp.allclose(out, ref, atol=2e-3, rtol=2e-3))

    print("KERNEL_OK")
</pallas_src>

<mosaic_0001>
module attributes {stable_mosaic.version = 11 : i64} {
  func.func @_fused_mnist_kernel(%arg0: memref<8x256xf32, #tpu.memory_space<vmem>>, %arg1: memref<256x1536xf32, #tpu.memory_space<vmem>>, %arg2: memref<1x384xf32, #tpu.memory_space<vmem>>, %arg3: memref<384x512xf32, #tpu.memory_space<vmem>>, %arg4: memref<1x128xf32, #tpu.memory_space<vmem>>, %arg5: memref<128x128xf32, #tpu.memory_space<vmem>>, %arg6: memref<1x128xf32, #tpu.memory_space<vmem>>, %arg7: memref<128x128xf32, #tpu.memory_space<vmem>>, %arg8: memref<1x128xf32, #tpu.memory_space<vmem>>, %arg9: memref<8x128xf32, #tpu.memory_space<vmem>>) attributes {dimension_semantics = [], scalar_prefetch = 0 : i64, scratch_operands = 0 : i64, tpu.core_type = #tpu.core_type<tc>} {
    %c0 = arith.constant 0 : index
    %c0_0 = arith.constant 0 : index
    %0 = vector.load %arg0[%c0, %c0_0] : memref<8x256xf32, #tpu.memory_space<vmem>>, vector<8x256xf32>
    %c0_1 = arith.constant 0 : index
    %c0_2 = arith.constant 0 : index
    %1 = vector.load %arg1[%c0_1, %c0_2] : memref<256x1536xf32, #tpu.memory_space<vmem>>, vector<256x1536xf32>
    %cst = arith.constant dense<0.000000e+00> : vector<8x1536xf32>
    %2 = tpu.matmul %0, %1, %cst {dimension_numbers = #tpu.dot_dimension_numbers<[1], [0], [0], [1], [0, 0, 1, 1], [], []>} : vector<8x256xf32>, vector<256x1536xf32>, vector<8x1536xf32> -> vector<8x1536xf32>
    %3 = vector.extract_strided_slice %2 {offsets = [0, 0], sizes = [8, 384], strides = [1, 1]} : vector<8x1536xf32> to vector<8x384xf32>
    %4 = vector.extract_strided_slice %2 {offsets = [0, 384], sizes = [8, 384], strides = [1, 1]} : vector<8x1536xf32> to vector<8x384xf32>
    %5 = arith.maximumf %3, %4 : vector<8x384xf32>
    %6 = vector.extract_strided_slice %2 {offsets = [0, 768], sizes = [8, 384], strides = [1, 1]} : vector<8x1536xf32> to vector<8x384xf32>
    %7 = vector.extract_strided_slice %2 {offsets = [0, 1152], sizes = [8, 384], strides = [1, 1]} : vector<8x1536xf32> to vector<8x384xf32>
    %8 = arith.maximumf %6, %7 : vector<8x384xf32>
    %9 = arith.maximumf %5, %8 : vector<8x384xf32>
    %c0_3 = arith.constant 0 : index
    %c0_4 = arith.constant 0 : index
    %10 = vector.load %arg2[%c0_3, %c0_4] : memref<1x384xf32, #tpu.memory_space<vmem>>, vector<1x384xf32>
    %11 = vector.broadcast %10 : vector<1x384xf32> to vector<8x384xf32>
    %12 = arith.addf %9, %11 : vector<8x384xf32>
    %cst_5 = arith.constant 0.000000e+00 : f32
    %13 = vector.broadcast %cst_5 : f32 to vector<8x384xf32>
    %14 = arith.maximumf %12, %13 : vector<8x384xf32>
    %c0_6 = arith.constant 0 : index
    %c0_7 = arith.constant 0 : index
    %15 = vector.load %arg3[%c0_6, %c0_7] : memref<384x512xf32, #tpu.memory_space<vmem>>, vector<384x512xf32>
    %cst_8 = arith.constant dense<0.000000e+00> : vector<8x512xf32>
    %16 = tpu.matmul %14, %15, %cst_8 {dimension_numbers = #tpu.dot_dimension_numbers<[1], [0], [0], [1], [0, 0, 1, 1], [], []>} : vector<8x384xf32>, vector<384x512xf32>, vector<8x512xf32> -> vector<8x512xf32>
    %17 = vector.extract_strided_slice %16 {offsets = [0, 0], sizes = [8, 128], strides = [1, 1]} : vector<8x512xf32> to vector<8x128xf32>
    %18 = vector.extract_strided_slice %16 {offsets = [0, 128], sizes = [8, 128], strides = [1, 1]} : vector<8x512xf32> to vector<8x128xf32>
    %19 = arith.maximumf %17, %18 : vector<8x128xf32>
    %20 = vector.extract_strided_slice %16 {offsets = [0, 256], sizes = [8, 128], strides = [1, 1]} : vector<8x512xf32> to vector<8x128xf32>
    %21 = vector.extract_strided_slice %16 {offsets = [0, 384], sizes = [8, 128], strides = [1, 1]} : vector<8x512xf32> to vector<8x128xf32>
    %22 = arith.maximumf %20, %21 : vector<8x128xf32>
    %23 = arith.maximumf %19, %22 : vector<8x128xf32>
    %c0_9 = arith.constant 0 : index
    %c0_10 = arith.constant 0 : index
    %24 = vector.load %arg4[%c0_9, %c0_10] : memref<1x128xf32, #tpu.memory_space<vmem>>, vector<1x128xf32>
    %25 = vector.broadcast %24 : vector<1x128xf32> to vector<8x128xf32>
    %26 = arith.addf %23, %25 : vector<8x128xf32>
    %cst_11 = arith.constant 0.000000e+00 : f32
    %27 = vector.broadcast %cst_11 : f32 to vector<8x128xf32>
    %28 = arith.maximumf %26, %27 : vector<8x128xf32>
    %c0_12 = arith.constant 0 : index
    %c0_13 = arith.constant 0 : index
    %29 = vector.load %arg5[%c0_12, %c0_13] : memref<128x128xf32, #tpu.memory_space<vmem>>, vector<128x128xf32>
    %cst_14 = arith.constant dense<0.000000e+00> : vector<8x128xf32>
    %30 = tpu.matmul %28, %29, %cst_14 {dimension_numbers = #tpu.dot_dimension_numbers<[1], [0], [0], [1], [0, 0, 1, 1], [], []>} : vector<8x128xf32>, vector<128x128xf32>, vector<8x128xf32> -> vector<8x128xf32>
    %c0_15 = arith.constant 0 : index
    %c0_16 = arith.constant 0 : index
    %31 = vector.load %arg6[%c0_15, %c0_16] : memref<1x128xf32, #tpu.memory_space<vmem>>, vector<1x128xf32>
    %32 = vector.broadcast %31 : vector<1x128xf32> to vector<8x128xf32>
    %33 = arith.addf %30, %32 : vector<8x128xf32>
    %cst_17 = arith.constant 0.000000e+00 : f32
    %34 = vector.broadcast %cst_17 : f32 to vector<8x128xf32>
    %35 = arith.maximumf %33, %34 : vector<8x128xf32>
    %c0_18 = arith.constant 0 : index
    %c0_19 = arith.constant 0 : index
    %36 = vector.load %arg7[%c0_18, %c0_19] : memref<128x128xf32, #tpu.memory_space<vmem>>, vector<128x128xf32>
    %cst_20 = arith.constant dense<0.000000e+00> : vector<8x128xf32>
    %37 = tpu.matmul %35, %36, %cst_20 {dimension_numbers = #tpu.dot_dimension_numbers<[1], [0], [0], [1], [0, 0, 1, 1], [], []>} : vector<8x128xf32>, vector<128x128xf32>, vector<8x128xf32> -> vector<8x128xf32>
    %c0_21 = arith.constant 0 : index
    %c0_22 = arith.constant 0 : index
    %38 = vector.load %arg8[%c0_21, %c0_22] : memref<1x128xf32, #tpu.memory_space<vmem>>, vector<1x128xf32>
    %39 = vector.broadcast %38 : vector<1x128xf32> to vector<8x128xf32>
    %40 = arith.addf %37, %39 : vector<8x128xf32>
    %41 = tpu.iota {dimensions = array<i32: 1>} : vector<8x128xi32>
    %c10_i32 = arith.constant 10 : i32
    %42 = vector.broadcast %c10_i32 : i32 to vector<8x128xi32>
    %43 = arith.cmpi slt, %41, %42 : vector<8x128xi32>
    %cst_23 = arith.constant -1.000000e+30 : f32
    %44 = vector.broadcast %cst_23 : f32 to vector<8x128xf32>
    %45 = arith.select %43, %40, %44 : vector<8x128xi1>, vector<8x128xf32>
    %cst_24 = arith.constant dense<0xFF800000> : vector<8xf32>
    %46 = vector.multi_reduction <maximumf>, %45, %cst_24 [1] : vector<8x128xf32> to vector<8xf32>
    %47 = vector.shape_cast %46 : vector<8xf32> to vector<8x1xf32>
    %48 = vector.broadcast %47 : vector<8x1xf32> to vector<8x128xf32>
    %49 = arith.subf %45, %48 : vector<8x128xf32>
    %50 = math.exp %49 : vector<8x128xf32>
    %cst_25 = arith.constant dense<0.000000e+00> : vector<8xf32>
    %51 = vector.multi_reduction <add>, %50, %cst_25 [1] : vector<8x128xf32> to vector<8xf32>
    %52 = vector.shape_cast %51 : vector<8xf32> to vector<8x1xf32>
    %53 = vector.broadcast %52 : vector<8x1xf32> to vector<8x128xf32>
    %54 = arith.divf %50, %53 : vector<8x128xf32>
    %c0_26 = arith.constant 0 : index
    %c0_27 = arith.constant 0 : index
    %55 = vector.load %arg9[%c0_26, %c0_27] : memref<8x128xf32, #tpu.memory_space<vmem>>, vector<8x128xf32>
    tpu.vector_store %arg9[%c0_26, %c0_27], %54 {strides = array<i32>} : memref<8x128xf32, #tpu.memory_space<vmem>>, vector<8x128xf32>,
    return
  }
}

</mosaic_0001>

<bundles_post_ra>
// kernel: forward.1
= control target key start
LH: loop header
LB: loop body
LE: loop exit
PB: predicated region body
PF: predicated region fallthrough
CT: control target
= control target key end

     0   :  { %vm1685_vm0 = vmmov 0   ;;  %s3651_s1 = inlined_call_operand.vmem [shape: f32[256,1536], index: 1, kind: input, shape index: {}]   ;;  %s3652_s0 = inlined_call_operand.vmem [shape: f32[8,256], index: 0, kind: input, shape index: {}]   ;;  %s3653_s3 = inlined_call_operand.vmem [shape: f32[384,512], index: 3, kind: input, shape index: {}]   ;;  %s3654_s2 = inlined_call_operand.vmem [shape: f32[1,384], index: 2, kind: input, shape index: {}]   ;;  %s3655_s5 = inlined_call_operand.vmem [shape: f32[128,128], index: 5, kind: input, shape index: {}]   ;;  %s3656_s7 = inlined_call_operand.vmem [shape: f32[128,128], index: 7, kind: input, shape index: {}]   ;;  %s3657_s4 = inlined_call_operand.vmem [shape: f32[1,128], index: 4, kind: input, shape index: {}]   ;;  %s3658_s6 = inlined_call_operand.vmem [shape: f32[1,128], index: 6, kind: input, shape index: {}]   ;;  %s3659_s8 = inlined_call_operand.vmem [shape: f32[1,128], index: 8, kind: input, shape index: {}]   ;;  %s3660_s9 = inlined_call_operand.vmem [shape: f32[8,128], index: 9, kind: output, shape index: {}]  }
   0x1   :  { %v215_v0 = vld [vmem:[%s3651_s1 + $0x5a8] sm:$0xff]  ;;  %v217_v1 = vld [vmem:[%s3651_s1 + $0x5b8] sm:$0xff]  ;;  %v214_v2 = vld [vmem:[%s3651_s1 + $0x5a0] sm:$0xff] }
   0x2   :  { %418 = vmatprep.subr.mxu0 %v215_v0  ;;  %489 = vmatprep.subr.mxu1 %v217_v1  ;;  %v216_v3 = vld [vmem:[%s3651_s1 + $0x5b0] sm:$0xff]  ;;  %v203_v4 = vld [vmem:[%s3651_s1 + $0x548] sm:$0xff]  ;;  %v205_v5 = vld [vmem:[%s3651_s1 + $0x558] sm:$0xff] }
   0x3   :  { %419 = vmatpush1.msra.mxu0 %v214_v2  ;;  %490 = vmatpush1.msra.mxu1 %v216_v3  ;;  %v202_v6 = vld [vmem:[%s3651_s1 + $0x540] sm:$0xff]  ;;  %v204_v7 = vld [vmem:[%s3651_s1 + $0x550] sm:$0xff]  ;;  %v191_v8 = vld [vmem:[%s3651_s1 + $0x4e8] sm:$0xff] }
   0x4   :  { %420 = vmatprep.subr.mxu0 %v203_v4  ;;  %491 = vmatprep.subr.mxu1 %v205_v5  ;;  %v193_v9 = vld [vmem:[%s3651_s1 + $0x4f8] sm:$0xff]  ;;  %v190_v10 = vld [vmem:[%s3651_s1 + $0x4e0] sm:$0xff]  ;;  %v192_v11 = vld [vmem:[%s3651_s1 + $0x4f0] sm:$0xff] }
   0x5   :  { %421 = vmatpush1.msra.mxu0 %v202_v6  ;;  %492 = vmatpush1.msra.mxu1 %v204_v7  ;;  %v179_v12 = vld [vmem:[%s3651_s1 + $0x488] sm:$0xff]  ;;  %v181_v13 = vld [vmem:[%s3651_s1 + $0x498] sm:$0xff]  ;;  %v178_v14 = vld [vmem:[%s3651_s1 + $0x480] sm:$0xff] }
   0x6   :  { %422 = vmatprep.subr.mxu0 %v191_v8  ;;  %493 = vmatprep.subr.mxu1 %v193_v9  ;;  %v180_v15 = vld [vmem:[%s3651_s1 + $0x490] sm:$0xff]  ;;  %v167_v16 = vld [vmem:[%s3651_s1 + $0x428] sm:$0xff]  ;;  %v169_v17 = vld [vmem:[%s3651_s1 + $0x438] sm:$0xff] }
   0x7   :  { %423 = vmatpush1.msra.mxu0 %v190_v10  ;;  %494 = vmatpush1.msra.mxu1 %v192_v11  ;;  %v166_v18 = vld [vmem:[%s3651_s1 + $0x420] sm:$0xff]  ;;  %v168_v19 = vld [vmem:[%s3651_s1 + $0x430] sm:$0xff]  ;;  %v155_v20 = vld [vmem:[%s3651_s1 + $0x3c8] sm:$0xff] }
   0x8   :  { %424 = vmatprep.subr.mxu0 %v179_v12  ;;  %495 = vmatprep.subr.mxu1 %v181_v13  ;;  %v157_v21 = vld [vmem:[%s3651_s1 + $0x3d8] sm:$0xff]  ;;  %v154_v22 = vld [vmem:[%s3651_s1 + $0x3c0] sm:$0xff]  ;;  %v156_v23 = vld [vmem:[%s3651_s1 + $0x3d0] sm:$0xff] }
   0x9   :  { %425 = vmatpush1.msra.mxu0 %v178_v14  ;;  %496 = vmatpush1.msra.mxu1 %v180_v15  ;;  %v143_v24 = vld [vmem:[%s3651_s1 + $0x368] sm:$0xff]  ;;  %v145_v25 = vld [vmem:[%s3651_s1 + $0x378] sm:$0xff]  ;;  %v142_v26 = vld [vmem:[%s3651_s1 + $0x360] sm:$0xff] }
   0xa   :  { %426 = vmatprep.subr.mxu0 %v167_v16  ;;  %497 = vmatprep.subr.mxu1 %v169_v17  ;;  %v144_v27 = vld [vmem:[%s3651_s1 + $0x370] sm:$0xff]  ;;  %v131_v28 = vld [vmem:[%s3651_s1 + $0x308] sm:$0xff]  ;;  %v133_v29 = vld [vmem:[%s3651_s1 + $0x318] sm:$0xff] }
   0xb   :  { %427 = vmatpush1.msra.mxu0 %v166_v18  ;;  %498 = vmatpush1.msra.mxu1 %v168_v19  ;;  %v130_v30 = vld [vmem:[%s3651_s1 + $0x300] sm:$0xff]  ;;  %v132_v31 = vld [vmem:[%s3651_s1 + $0x310] sm:$0xff]  ;;  %v119_v32 = vld [vmem:[%s3651_s1 + $0x2a8] sm:$0xff] }
   0xc   :  { %428 = vmatprep.subr.mxu0 %v155_v20  ;;  %499 = vmatprep.subr.mxu1 %v157_v21  ;;  %v121_v33 = vld [vmem:[%s3651_s1 + $0x2b8] sm:$0xff]  ;;  %v118_v34 = vld [vmem:[%s3651_s1 + $0x2a0] sm:$0xff]  ;;  %v120_v35 = vld [vmem:[%s3651_s1 + $0x2b0] sm:$0xff] }
   0xd   :  { %429 = vmatpush1.msra.mxu0 %v154_v22  ;;  %500 = vmatpush1.msra.mxu1 %v156_v23  ;;  %v107_v36 = vld [vmem:[%s3651_s1 + $0x248] sm:$0xff]  ;;  %v109_v37 = vld [vmem:[%s3651_s1 + $0x258] sm:$0xff]  ;;  %v106_v38 = vld [vmem:[%s3651_s1 + $0x240] sm:$0xff] }
   0xe   :  { %430 = vmatprep.subr.mxu0 %v143_v24  ;;  %501 = vmatprep.subr.mxu1 %v145_v25  ;;  %v108_v39 = vld [vmem:[%s3651_s1 + $0x250] sm:$0xff]  ;;  %v95_v40 = vld [vmem:[%s3651_s1 + $0x1e8] sm:$0xff]  ;;  %v97_v41 = vld [vmem:[%s3651_s1 + $0x1f8] sm:$0xff] }
   0xf   :  { %431 = vmatpush1.msra.mxu0 %v142_v26  ;;  %502 = vmatpush1.msra.mxu1 %v144_v27  ;;  %v94_v42 = vld [vmem:[%s3651_s1 + $0x1e0] sm:$0xff]  ;;  %v96_v43 = vld [vmem:[%s3651_s1 + $0x1f0] sm:$0xff]  ;;  %v83_v44 = vld [vmem:[%s3651_s1 + $0x188] sm:$0xff] }
  0x10   :  { %432 = vmatprep.subr.mxu0 %v131_v28  ;;  %503 = vmatprep.subr.mxu1 %v133_v29  ;;  %v85_v45 = vld [vmem:[%s3651_s1 + $0x198] sm:$0xff]  ;;  %v82_v46 = vld [vmem:[%s3651_s1 + $0x180] sm:$0xff]  ;;  %v84_v47 = vld [vmem:[%s3651_s1 + $0x190] sm:$0xff] }
  0x11   :  { %433 = vmatpush1.msra.mxu0 %v130_v30  ;;  %504 = vmatpush1.msra.mxu1 %v132_v31  ;;  %v71_v48 = vld [vmem:[%s3651_s1 + $0x128] sm:$0xff]  ;;  %v73_v49 = vld [vmem:[%s3651_s1 + $0x138] sm:$0xff]  ;;  %v70_v50 = vld [vmem:[%s3651_s1 + $0x120] sm:$0xff] }
  0x12   :  { %434 = vmatprep.subr.mxu0 %v119_v32  ;;  %505 = vmatprep.subr.mxu1 %v121_v33  ;;  %v72_v51 = vld [vmem:[%s3651_s1 + $0x130] sm:$0xff]  ;;  %v59_v52 = vld [vmem:[%s3651_s1 + $0xc8] sm:$0xff]  ;;  %v61_v53 = vld [vmem:[%s3651_s1 + $0xd8] sm:$0xff] }
  0x13   :  { %435 = vmatpush1.msra.mxu0 %v118_v34  ;;  %506 = vmatpush1.msra.mxu1 %v120_v35  ;;  %v58_v54 = vld [vmem:[%s3651_s1 + $0xc0] sm:$0xff]  ;;  %v60_v55 = vld [vmem:[%s3651_s1 + $0xd0] sm:$0xff]  ;;  %v47_v56 = vld [vmem:[%s3651_s1 + $0x68] sm:$0xff] }
  0x14   :  { %436 = vmatprep.subr.mxu0 %v107_v36  ;;  %507 = vmatprep.subr.mxu1 %v109_v37  ;;  %v49_v57 = vld [vmem:[%s3651_s1 + $0x78] sm:$0xff]  ;;  %v46_v58 = vld [vmem:[%s3651_s1 + $0x60] sm:$0xff]  ;;  %v48_v59 = vld [vmem:[%s3651_s1 + $0x70] sm:$0xff] }
  0x15   :  { %437 = vmatpush1.msra.mxu0 %v106_v38  ;;  %508 = vmatpush1.msra.mxu1 %v108_v39  ;;  %v35_v60 = vld [vmem:[%s3651_s1 + $0x8] sm:$0xff]  ;;  %v37_v61 = vld [vmem:[%s3651_s1 + $0x18] sm:$0xff]  ;;  %v34_v62 = vld [vmem:[%s3651_s1] sm:$0xff] }
  0x16   :  { %438 = vmatprep.subr.mxu0 %v95_v40  ;;  %509 = vmatprep.subr.mxu1 %v97_v41  ;;  %v36_v63 = vld [vmem:[%s3651_s1 + $0x10] sm:$0xff]  ;;  %v407_v0 = vld [vmem:[%s3651_s1 + $0xba8] sm:$0xff]  ;;  %v409_v1 = vld [vmem:[%s3651_s1 + $0xbb8] sm:$0xff] }
  0x17   :  { %439 = vmatpush1.msra.mxu0 %v94_v42  ;;  %510 = vmatpush1.msra.mxu1 %v96_v43  ;;  %v406_v2 = vld [vmem:[%s3651_s1 + $0xba0] sm:$0xff]  ;;  %v408_v3 = vld [vmem:[%s3651_s1 + $0xbb0] sm:$0xff]  ;;  %v395_v4 = vld [vmem:[%s3651_s1 + $0xb48] sm:$0xff] }
  0x18   :  { %440 = vmatprep.subr.mxu0 %v83_v44  ;;  %511 = vmatprep.subr.mxu1 %v85_v45  ;;  %v397_v5 = vld [vmem:[%s3651_s1 + $0xb58] sm:$0xff]  ;;  %v394_v6 = vld [vmem:[%s3651_s1 + $0xb40] sm:$0xff]  ;;  %v396_v7 = vld [vmem:[%s3651_s1 + $0xb50] sm:$0xff] }
  0x19   :  { %441 = vmatpush1.msra.mxu0 %v82_v46  ;;  %512 = vmatpush1.msra.mxu1 %v84_v47  ;;  %v383_v8 = vld [vmem:[%s3651_s1 + $0xae8] sm:$0xff]  ;;  %v385_v9 = vld [vmem:[%s3651_s1 + $0xaf8] sm:$0xff]  ;;  %v382_v10 = vld [vmem:[%s3651_s1 + $0xae0] sm:$0xff] }
  0x1a   :  { %442 = vmatprep.subr.mxu0 %v71_v48  ;;  %513 = vmatprep.subr.mxu1 %v73_v49  ;;  %v384_v11 = vld [vmem:[%s3651_s1 + $0xaf0] sm:$0xff]  ;;  %v371_v12 = vld [vmem:[%s3651_s1 + $0xa88] sm:$0xff]  ;;  %v373_v13 = vld [vmem:[%s3651_s1 + $0xa98] sm:$0xff] }
  0x1b   :  { %443 = vmatpush1.msra.mxu0 %v70_v50  ;;  %514 = vmatpush1.msra.mxu1 %v72_v51  ;;  %v370_v14 = vld [vmem:[%s3651_s1 + $0xa80] sm:$0xff]  ;;  %v372_v15 = vld [vmem:[%s3651_s1 + $0xa90] sm:$0xff]  ;;  %v359_v16 = vld [vmem:[%s3651_s1 + $0xa28] sm:$0xff] }
  0x1c   :  { %444 = vmatprep.subr.mxu0 %v59_v52  ;;  %515 = vmatprep.subr.mxu1 %v61_v53  ;;  %v361_v17 = vld [vmem:[%s3651_s1 + $0xa38] sm:$0xff]  ;;  %v358_v18 = vld [vmem:[%s3651_s1 + $0xa20] sm:$0xff]  ;;  %v360_v19 = vld [vmem:[%s3651_s1 + $0xa30] sm:$0xff] }
  0x1d   :  { %445 = vmatpush1.msra.mxu0 %v58_v54  ;;  %516 = vmatpush1.msra.mxu1 %v60_v55  ;;  %v347_v20 = vld [vmem:[%s3651_s1 + $0x9c8] sm:$0xff]  ;;  %v349_v21 = vld [vmem:[%s3651_s1 + $0x9d8] sm:$0xff]  ;;  %v346_v22 = vld [vmem:[%s3651_s1 + $0x9c0] sm:$0xff] }
  0x1e   :  { %446 = vmatprep.subr.mxu0 %v47_v56  ;;  %517 = vmatprep.subr.mxu1 %v49_v57  ;;  %v348_v23 = vld [vmem:[%s3651_s1 + $0x9d0] sm:$0xff]  ;;  %v335_v24 = vld [vmem:[%s3651_s1 + $0x968] sm:$0xff]  ;;  %v337_v25 = vld [vmem:[%s3651_s1 + $0x978] sm:$0xff] }
  0x1f   :  { %447 = vmatpush1.msra.mxu0 %v46_v58  ;;  %518 = vmatpush1.msra.mxu1 %v48_v59  ;;  %v334_v26 = vld [vmem:[%s3651_s1 + $0x960] sm:$0xff]  ;;  %v336_v27 = vld [vmem:[%s3651_s1 + $0x970] sm:$0xff]  ;;  %v323_v28 = vld [vmem:[%s3651_s1 + $0x908] sm:$0xff] }
  0x20   :  { %448 = vmatprep.subr.mxu0 %v35_v60  ;;  %519 = vmatprep.subr.mxu1 %v37_v61  ;;  %v325_v29 = vld [vmem:[%s3651_s1 + $0x918] sm:$0xff]  ;;  %v322_v30 = vld [vmem:[%s3651_s1 + $0x900] sm:$0xff]  ;;  %v324_v31 = vld [vmem:[%s3651_s1 + $0x910] sm:$0xff] }
  0x21   :  { %449 = vmatpush1.msra.mxu0 %v34_v62  ;;  %520 = vmatpush1.msra.mxu1 %v36_v63  ;;  %v311_v32 = vld [vmem:[%s3651_s1 + $0x8a8] sm:$0xff]  ;;  %v313_v33 = vld [vmem:[%s3651_s1 + $0x8b8] sm:$0xff]  ;;  %v310_v34 = vld [vmem:[%s3651_s1 + $0x8a0] sm:$0xff] }
  0x22   :  { %450 = vmatprep.subr.mxu0 %v407_v0  ;;  %521 = vmatprep.subr.mxu1 %v409_v1  ;;  %v312_v35 = vld [vmem:[%s3651_s1 + $0x8b0] sm:$0xff]  ;;  %v299_v36 = vld [vmem:[%s3651_s1 + $0x848] sm:$0xff]  ;;  %v301_v37 = vld [vmem:[%s3651_s1 + $0x858] sm:$0xff] }
  0x23   :  { %451 = vmatpush2.msra.mxu0 %v406_v2  ;;  %522 = vmatpush2.msra.mxu1 %v408_v3  ;;  %v298_v38 = vld [vmem:[%s3651_s1 + $0x840] sm:$0xff]  ;;  %v300_v39 = vld [vmem:[%s3651_s1 + $0x850] sm:$0xff]  ;;  %v287_v40 = vld [vmem:[%s3651_s1 + $0x7e8] sm:$0xff] }
  0x24   :  { %452 = vmatprep.subr.mxu0 %v395_v4  ;;  %523 = vmatprep.subr.mxu1 %v397_v5  ;;  %v289_v41 = vld [vmem:[%s3651_s1 + $0x7f8] sm:$0xff]  ;;  %v286_v42 = vld [vmem:[%s3651_s1 + $0x7e0] sm:$0xff]  ;;  %v288_v43 = vld [vmem:[%s3651_s1 + $0x7f0] sm:$0xff] }
  0x25   :  { %453 = vmatpush2.msra.mxu0 %v394_v6  ;;  %524 = vmatpush2.msra.mxu1 %v396_v7  ;;  %v275_v44 = vld [vmem:[%s3651_s1 + $0x788] sm:$0xff]  ;;  %v277_v45 = vld [vmem:[%s3651_s1 + $0x798] sm:$0xff]  ;;  %v274_v46 = vld [vmem:[%s3651_s1 + $0x780] sm:$0xff] }
  0x26   :  { %454 = vmatprep.subr.mxu0 %v383_v8  ;;  %525 = vmatprep.subr.mxu1 %v385_v9  ;;  %v276_v47 = vld [vmem:[%s3651_s1 + $0x790] sm:$0xff]  ;;  %v263_v48 = vld [vmem:[%s3651_s1 + $0x728] sm:$0xff]  ;;  %v265_v49 = vld [vmem:[%s3651_s1 + $0x738] sm:$0xff] }
  0x27   :  { %455 = vmatpush2.msra.mxu0 %v382_v10  ;;  %526 = vmatpush2.msra.mxu1 %v384_v11  ;;  %v262_v50 = vld [vmem:[%s3651_s1 + $0x720] sm:$0xff]  ;;  %v264_v51 = vld [vmem:[%s3651_s1 + $0x730] sm:$0xff]  ;;  %v251_v52 = vld [vmem:[%s3651_s1 + $0x6c8] sm:$0xff] }
  0x28   :  { %456 = vmatprep.subr.mxu0 %v371_v12  ;;  %527 = vmatprep.subr.mxu1 %v373_v13  ;;  %v253_v53 = vld [vmem:[%s3651_s1 + $0x6d8] sm:$0xff]  ;;  %v250_v54 = vld [vmem:[%s3651_s1 + $0x6c0] sm:$0xff]  ;;  %v252_v55 = vld [vmem:[%s3651_s1 + $0x6d0] sm:$0xff] }
  0x29   :  { %457 = vmatpush2.msra.mxu0 %v370_v14  ;;  %528 = vmatpush2.msra.mxu1 %v372_v15  ;;  %v239_v56 = vld [vmem:[%s3651_s1 + $0x668] sm:$0xff]  ;;  %v241_v57 = vld [vmem:[%s3651_s1 + $0x678] sm:$0xff]  ;;  %v238_v58 = vld [vmem:[%s3651_s1 + $0x660] sm:$0xff] }
  0x2a   :  { %458 = vmatprep.subr.mxu0 %v359_v16  ;;  %529 = vmatprep.subr.mxu1 %v361_v17  ;;  %v240_v59 = vld [vmem:[%s3651_s1 + $0x670] sm:$0xff]  ;;  %v227_v60 = vld [vmem:[%s3651_s1 + $0x608] sm:$0xff]  ;;  %v229_v61 = vld [vmem:[%s3651_s1 + $0x618] sm:$0xff] }
  0x2b   :  { %459 = vmatpush2.msra.mxu0 %v358_v18  ;;  %530 = vmatpush2.msra.mxu1 %v360_v19  ;;  %v226_v62 = vld [vmem:[%s3651_s1 + $0x600] sm:$0xff]  ;;  %v228_v63 = vld [vmem:[%s3651_s1 + $0x610] sm:$0xff]  ;;  %v2123_v0 = vld [vmem:[%s3652_s0 + $0x8] sm:$0xff] }
  0x2c   :  { %460 = vmatprep.subr.mxu0 %v347_v20  ;;  %531 = vmatprep.subr.mxu1 %v349_v21  ;;  %v2128_v1 = vld [vmem:[%s3652_s0] sm:$0xff]  ;;  %v219_v2 = vld [vmem:[%s3651_s1 + $0x5c8] sm:$0xff]  ;;  %v221_v3 = vld [vmem:[%s3651_s1 + $0x5d8] sm:$0xff] }
  0x2d   :  { %461 = vmatpush2.msra.mxu0 %v346_v22  ;;  %532 = vmatpush2.msra.mxu1 %v348_v23  ;;  %v218_v4 = vld [vmem:[%s3651_s1 + $0x5c0] sm:$0xff]  ;;  %v220_v5 = vld [vmem:[%s3651_s1 + $0x5d0] sm:$0xff]  ;;  %v207_v6 = vld [vmem:[%s3651_s1 + $0x568] sm:$0xff] }
  0x2e   :  { %462 = vmatprep.subr.mxu0 %v335_v24  ;;  %533 = vmatprep.subr.mxu1 %v337_v25  ;;  %v209_v7 = vld [vmem:[%s3651_s1 + $0x578] sm:$0xff]  ;;  %v206_v8 = vld [vmem:[%s3651_s1 + $0x560] sm:$0xff]  ;;  %v208_v9 = vld [vmem:[%s3651_s1 + $0x570] sm:$0xff] }
  0x2f   :  { %463 = vmatpush2.msra.mxu0 %v334_v26  ;;  %534 = vmatpush2.msra.mxu1 %v336_v27  ;;  %v195_v10 = vld [vmem:[%s3651_s1 + $0x508] sm:$0xff]  ;;  %v197_v11 = vld [vmem:[%s3651_s1 + $0x518] sm:$0xff]  ;;  %v194_v12 = vld [vmem:[%s3651_s1 + $0x500] sm:$0xff] }
  0x30   :  { %464 = vmatprep.subr.mxu0 %v323_v28  ;;  %535 = vmatprep.subr.mxu1 %v325_v29  ;;  %v196_v13 = vld [vmem:[%s3651_s1 + $0x510] sm:$0xff]  ;;  %v183_v14 = vld [vmem:[%s3651_s1 + $0x4a8] sm:$0xff]  ;;  %v185_v15 = vld [vmem:[%s3651_s1 + $0x4b8] sm:$0xff] }
  0x31   :  { %465 = vmatpush2.msra.mxu0 %v322_v30  ;;  %536 = vmatpush2.msra.mxu1 %v324_v31  ;;  %v182_v16 = vld [vmem:[%s3651_s1 + $0x4a0] sm:$0xff]  ;;  %v184_v17 = vld [vmem:[%s3651_s1 + $0x4b0] sm:$0xff]  ;;  %v171_v18 = vld [vmem:[%s3651_s1 + $0x448] sm:$0xff] }
  0x32   :  { %466 = vmatprep.subr.mxu0 %v311_v32  ;;  %537 = vmatprep.subr.mxu1 %v313_v33  ;;  %v173_v19 = vld [vmem:[%s3651_s1 + $0x458] sm:$0xff]  ;;  %v170_v20 = vld [vmem:[%s3651_s1 + $0x440] sm:$0xff]  ;;  %v172_v21 = vld [vmem:[%s3651_s1 + $0x450] sm:$0xff] }
  0x33   :  { %467 = vmatpush2.msra.mxu0 %v310_v34  ;;  %538 = vmatpush2.msra.mxu1 %v312_v35  ;;  %v159_v22 = vld [vmem:[%s3651_s1 + $0x3e8] sm:$0xff]  ;;  %v161_v23 = vld [vmem:[%s3651_s1 + $0x3f8] sm:$0xff]  ;;  %v158_v24 = vld [vmem:[%s3651_s1 + $0x3e0] sm:$0xff] }
  0x34   :  { %468 = vmatprep.subr.mxu0 %v299_v36  ;;  %539 = vmatprep.subr.mxu1 %v301_v37  ;;  %v160_v25 = vld [vmem:[%s3651_s1 + $0x3f0] sm:$0xff]  ;;  %v147_v26 = vld [vmem:[%s3651_s1 + $0x388] sm:$0xff]  ;;  %v149_v27 = vld [vmem:[%s3651_s1 + $0x398] sm:$0xff] }
  0x35   :  { %469 = vmatpush2.msra.mxu0 %v298_v38  ;;  %540 = vmatpush2.msra.mxu1 %v300_v39  ;;  %v146_v28 = vld [vmem:[%s3651_s1 + $0x380] sm:$0xff]  ;;  %v148_v29 = vld [vmem:[%s3651_s1 + $0x390] sm:$0xff]  ;;  %v135_v30 = vld [vmem:[%s3651_s1 + $0x328] sm:$0xff] }
  0x36   :  { %470 = vmatprep.subr.mxu0 %v287_v40  ;;  %541 = vmatprep.subr.mxu1 %v289_v41  ;;  %v137_v31 = vld [vmem:[%s3651_s1 + $0x338] sm:$0xff]  ;;  %v134_v32 = vld [vmem:[%s3651_s1 + $0x320] sm:$0xff]  ;;  %v136_v33 = vld [vmem:[%s3651_s1 + $0x330] sm:$0xff] }
  0x37   :  { %471 = vmatpush2.msra.mxu0 %v286_v42  ;;  %542 = vmatpush2.msra.mxu1 %v288_v43  ;;  %v123_v34 = vld [vmem:[%s3651_s1 + $0x2c8] sm:$0xff]  ;;  %v125_v35 = vld [vmem:[%s3651_s1 + $0x2d8] sm:$0xff]  ;;  %v122_v36 = vld [vmem:[%s3651_s1 + $0x2c0] sm:$0xff] }
  0x38   :  { %472 = vmatprep.subr.mxu0 %v275_v44  ;;  %543 = vmatprep.subr.mxu1 %v277_v45  ;;  %v124_v37 = vld [vmem:[%s3651_s1 + $0x2d0] sm:$0xff]  ;;  %v111_v38 = vld [vmem:[%s3651_s1 + $0x268] sm:$0xff]  ;;  %v113_v39 = vld [vmem:[%s3651_s1 + $0x278] sm:$0xff] }
  0x39   :  { %473 = vmatpush2.msra.mxu0 %v274_v46  ;;  %544 = vmatpush2.msra.mxu1 %v276_v47  ;;  %v110_v40 = vld [vmem:[%s3651_s1 + $0x260] sm:$0xff]  ;;  %v112_v41 = vld [vmem:[%s3651_s1 + $0x270] sm:$0xff]  ;;  %v99_v42 = vld [vmem:[%s3651_s1 + $0x208] sm:$0xff] }
  0x3a   :  { %474 = vmatprep.subr.mxu0 %v263_v48  ;;  %545 = vmatprep.subr.mxu1 %v265_v49  ;;  %v101_v43 = vld [vmem:[%s3651_s1 + $0x218] sm:$0xff]  ;;  %v98_v44 = vld [vmem:[%s3651_s1 + $0x200] sm:$0xff]  ;;  %v100_v45 = vld [vmem:[%s3651_s1 + $0x210] sm:$0xff] }
  0x3b   :  { %475 = vmatpush2.msra.mxu0 %v262_v50  ;;  %546 = vmatpush2.msra.mxu1 %v264_v51  ;;  %v87_v46 = vld [vmem:[%s3651_s1 + $0x1a8] sm:$0xff]  ;;  %v89_v47 = vld [vmem:[%s3651_s1 + $0x1b8] sm:$0xff]  ;;  %v86_v48 = vld [vmem:[%s3651_s1 + $0x1a0] sm:$0xff] }
  0x3c   :  { %476 = vmatprep.subr.mxu0 %v251_v52  ;;  %547 = vmatprep.subr.mxu1 %v253_v53  ;;  %v88_v49 = vld [vmem:[%s3651_s1 + $0x1b0] sm:$0xff]  ;;  %v75_v50 = vld [vmem:[%s3651_s1 + $0x148] sm:$0xff]  ;;  %v77_v51 = vld [vmem:[%s3651_s1 + $0x158] sm:$0xff] }
  0x3d   :  { %477 = vmatpush2.msra.mxu0 %v250_v54  ;;  %548 = vmatpush2.msra.mxu1 %v252_v55  ;;  %v74_v52 = vld [vmem:[%s3651_s1 + $0x140] sm:$0xff]  ;;  %v76_v53 = vld [vmem:[%s3651_s1 + $0x150] sm:$0xff]  ;;  %v63_v54 = vld [vmem:[%s3651_s1 + $0xe8] sm:$0xff] }
  0x3e   :  { %478 = vmatprep.subr.mxu0 %v239_v56  ;;  %549 = vmatprep.subr.mxu1 %v241_v57  ;;  %v65_v55 = vld [vmem:[%s3651_s1 + $0xf8] sm:$0xff]  ;;  %v62_v56 = vld [vmem:[%s3651_s1 + $0xe0] sm:$0xff]  ;;  %v64_v57 = vld [vmem:[%s3651_s1 + $0xf0] sm:$0xff] }
  0x3f   :  { %479 = vmatpush2.msra.mxu0 %v238_v58  ;;  %550 = vmatpush2.msra.mxu1 %v240_v59  ;;  %v51_v58 = vld [vmem:[%s3651_s1 + $0x88] sm:$0xff]  ;;  %v53_v59 = vld [vmem:[%s3651_s1 + $0x98] sm:$0xff] }
  0x40   :  { %480 = vmatprep.subr.mxu0 %v227_v60  ;;  %551 = vmatprep.subr.mxu1 %v229_v61  ;;  %v50_v60 = vld [vmem:[%s3651_s1 + $0x80] sm:$0xff]  ;;  %v52_v61 = vld [vmem:[%s3651_s1 + $0x90] sm:$0xff] }
  0x41   :  { %481 = vmatpush2.msra.mxu0 %v226_v62  ;;  %552 = vmatpush2.msra.mxu1 %v228_v63  ;;  %v39_v62 = vld [vmem:[%s3651_s1 + $0x28] sm:$0xff]  ;;  %v41_v63 = vld [vmem:[%s3651_s1 + $0x38] sm:$0xff] }
  0x42   :  { %553 = vmatprep.mubr.f32.mxu1 %v2123_v0  ;;  %482 = vmatprep.mubr.f32.mxu0 %v2123_v0 }
  0x43   :  { %554 = vmatmul.mubr.f32.vlgmr.msra.gmra.mxu1 %v2128_v1  ;;  %560 = vmatprep.subr.mxu0 %v219_v2  ;;  %v38_v2 = vld [vmem:[%s3651_s1 + $0x20] sm:$0xff] }
  0x44   :  { %631 = vmatprep.subr.mxu1 %v221_v3  ;;  %483 = vmatmul.mubr.f32.vlgmr.msra.gmra.mxu0 %v2128_v1  ;;  %v40_v3 = vld [vmem:[%s3651_s1 + $0x30] sm:$0xff] }
  0x45   :  { %561 = vmatpush1.msra.mxu0 %v218_v4  ;;  %632 = vmatpush1.msra.mxu1 %v220_v5  ;;  %v411_v4 = vld [vmem:[%s3651_s1 + $0xbc8] sm:$0xff]  ;;  %v413_v5 = vld [vmem:[%s3651_s1 + $0xbd8] sm:$0xff] }
  0x46   :  { %562 = vmatprep.subr.mxu0 %v207_v6  ;;  %633 = vmatprep.subr.mxu1 %v209_v7  ;;  %v410_v6 = vld [vmem:[%s3651_s1 + $0xbc0] sm:$0xff]  ;;  %v412_v7 = vld [vmem:[%s3651_s1 + $0xbd0] sm:$0xff] }
  0x47   :  { %563 = vmatpush1.msra.mxu0 %v206_v8  ;;  %634 = vmatpush1.msra.mxu1 %v208_v9  ;;  %v399_v8 = vld [vmem:[%s3651_s1 + $0xb68] sm:$0xff]  ;;  %v401_v9 = vld [vmem:[%s3651_s1 + $0xb78] sm:$0xff] }
  0x48   :  { %564 = vmatprep.subr.mxu0 %v195_v10  ;;  %635 = vmatprep.subr.mxu1 %v197_v11  ;;  %v398_v10 = vld [vmem:[%s3651_s1 + $0xb60] sm:$0xff]  ;;  %v400_v11 = vld [vmem:[%s3651_s1 + $0xb70] sm:$0xff] }
  0x49   :  { %565 = vmatpush1.msra.mxu0 %v194_v12  ;;  %636 = vmatpush1.msra.mxu1 %v196_v13  ;;  %v387_v12 = vld [vmem:[%s3651_s1 + $0xb08] sm:$0xff]  ;;  %v389_v13 = vld [vmem:[%s3651_s1 + $0xb18] sm:$0xff] }
  0x4a   :  { %566 = vmatprep.subr.mxu0 %v183_v14  ;;  %637 = vmatprep.subr.mxu1 %v185_v15  ;;  %v386_v14 = vld [vmem:[%s3651_s1 + $0xb00] sm:$0xff]  ;;  %v388_v15 = vld [vmem:[%s3651_s1 + $0xb10] sm:$0xff] }
  0x4b   :  { %567 = vmatpush1.msra.mxu0 %v182_v16  ;;  %638 = vmatpush1.msra.mxu1 %v184_v17  ;;  %v375_v16 = vld [vmem:[%s3651_s1 + $0xaa8] sm:$0xff]  ;;  %v377_v17 = vld [vmem:[%s3651_s1 + $0xab8] sm:$0xff] }
  0x4c   :  { %568 = vmatprep.subr.mxu0 %v171_v18  ;;  %639 = vmatprep.subr.mxu1 %v173_v19  ;;  %v374_v18 = vld [vmem:[%s3651_s1 + $0xaa0] sm:$0xff]  ;;  %v376_v19 = vld [vmem:[%s3651_s1 + $0xab0] sm:$0xff] }
  0x4d   :  { %569 = vmatpush1.msra.mxu0 %v170_v20  ;;  %640 = vmatpush1.msra.mxu1 %v172_v21  ;;  %v363_v20 = vld [vmem:[%s3651_s1 + $0xa48] sm:$0xff]  ;;  %v365_v21 = vld [vmem:[%s3651_s1 + $0xa58] sm:$0xff] }
  0x4e   :  { %570 = vmatprep.subr.mxu0 %v159_v22  ;;  %641 = vmatprep.subr.mxu1 %v161_v23  ;;  %v362_v22 = vld [vmem:[%s3651_s1 + $0xa40] sm:$0xff]  ;;  %v364_v23 = vld [vmem:[%s3651_s1 + $0xa50] sm:$0xff] }
  0x4f   :  { %571 = vmatpush1.msra.mxu0 %v158_v24  ;;  %642 = vmatpush1.msra.mxu1 %v160_v25  ;;  %v351_v24 = vld [vmem:[%s3651_s1 + $0x9e8] sm:$0xff]  ;;  %v353_v25 = vld [vmem:[%s3651_s1 + $0x9f8] sm:$0xff] }
  0x50   :  { %572 = vmatprep.subr.mxu0 %v147_v26  ;;  %643 = vmatprep.subr.mxu1 %v149_v27  ;;  %v350_v26 = vld [vmem:[%s3651_s1 + $0x9e0] sm:$0xff]  ;;  %v352_v27 = vld [vmem:[%s3651_s1 + $0x9f0] sm:$0xff] }
  0x51   :  { %573 = vmatpush1.msra.mxu0 %v146_v28  ;;  %644 = vmatpush1.msra.mxu1 %v148_v29  ;;  %v339_v28 = vld [vmem:[%s3651_s1 + $0x988] sm:$0xff]  ;;  %v341_v29 = vld [vmem:[%s3651_s1 + $0x998] sm:$0xff] }
  0x52   :  { %574 = vmatprep.subr.mxu0 %v135_v30  ;;  %645 = vmatprep.subr.mxu1 %v137_v31  ;;  %v338_v30 = vld [vmem:[%s3651_s1 + $0x980] sm:$0xff]  ;;  %v340_v31 = vld [vmem:[%s3651_s1 + $0x990] sm:$0xff] }
  0x53   :  { %575 = vmatpush1.msra.mxu0 %v134_v32  ;;  %646 = vmatpush1.msra.mxu1 %v136_v33  ;;  %v327_v32 = vld [vmem:[%s3651_s1 + $0x928] sm:$0xff]  ;;  %v329_v33 = vld [vmem:[%s3651_s1 + $0x938] sm:$0xff] }
  0x54   :  { %576 = vmatprep.subr.mxu0 %v123_v34  ;;  %647 = vmatprep.subr.mxu1 %v125_v35  ;;  %v326_v34 = vld [vmem:[%s3651_s1 + $0x920] sm:$0xff]  ;;  %v328_v35 = vld [vmem:[%s3651_s1 + $0x930] sm:$0xff] }
  0x55   :  { %577 = vmatpush1.msra.mxu0 %v122_v36  ;;  %648 = vmatpush1.msra.mxu1 %v124_v37  ;;  %v315_v36 = vld [vmem:[%s3651_s1 + $0x8c8] sm:$0xff]  ;;  %v317_v37 = vld [vmem:[%s3651_s1 + $0x8d8] sm:$0xff] }
  0x56   :  { %578 = vmatprep.subr.mxu0 %v111_v38  ;;  %649 = vmatprep.subr.mxu1 %v113_v39  ;;  %v314_v38 = vld [vmem:[%s3651_s1 + $0x8c0] sm:$0xff]  ;;  %v316_v39 = vld [vmem:[%s3651_s1 + $0x8d0] sm:$0xff] }
  0x57   :  { %579 = vmatpush1.msra.mxu0 %v110_v40  ;;  %650 = vmatpush1.msra.mxu1 %v112_v41  ;;  %v303_v40 = vld [vmem:[%s3651_s1 + $0x868] sm:$0xff]  ;;  %v305_v41 = vld [vmem:[%s3651_s1 + $0x878] sm:$0xff] }
  0x58   :  { %580 = vmatprep.subr.mxu0 %v99_v42  ;;  %651 = vmatprep.subr.mxu1 %v101_v43  ;;  %v302_v42 = vld [vmem:[%s3651_s1 + $0x860] sm:$0xff]  ;;  %v304_v43 = vld [vmem:[%s3651_s1 + $0x870] sm:$0xff] }
  0x59   :  { %581 = vmatpush1.msra.mxu0 %v98_v44  ;;  %652 = vmatpush1.msra.mxu1 %v100_v45  ;;  %v291_v44 = vld [vmem:[%s3651_s1 + $0x808] sm:$0xff]  ;;  %v293_v45 = vld [vmem:[%s3651_s1 + $0x818] sm:$0xff] }
  0x5a   :  { %582 = vmatprep.subr.mxu0 %v87_v46  ;;  %653 = vmatprep.subr.mxu1 %v89_v47  ;;  %v290_v46 = vld [vmem:[%s3651_s1 + $0x800] sm:$0xff]  ;;  %v292_v47 = vld [vmem:[%s3651_s1 + $0x810] sm:$0xff] }
  0x5b   :  { %583 = vmatpush1.msra.mxu0 %v86_v48  ;;  %654 = vmatpush1.msra.mxu1 %v88_v49  ;;  %v279_v48 = vld [vmem:[%s3651_s1 + $0x7a8] sm:$0xff]  ;;  %v281_v49 = vld [vmem:[%s3651_s1 + $0x7b8] sm:$0xff] }
  0x5c   :  { %584 = vmatprep.subr.mxu0 %v75_v50  ;;  %655 = vmatprep.subr.mxu1 %v77_v51  ;;  %v278_v50 = vld [vmem:[%s3651_s1 + $0x7a0] sm:$0xff]  ;;  %v280_v51 = vld [vmem:[%s3651_s1 + $0x7b0] sm:$0xff] }
  0x5d   :  { %585 = vmatpush1.msra.mxu0 %v74_v52  ;;  %656 = vmatpush1.msra.mxu1 %v76_v53  ;;  %v267_v52 = vld [vmem:[%s3651_s1 + $0x748] sm:$0xff]  ;;  %v269_v53 = vld [vmem:[%s3651_s1 + $0x758] sm:$0xff] }
  0x5e   :  { %586 = vmatprep.subr.mxu0 %v63_v54  ;;  %657 = vmatprep.subr.mxu1 %v65_v55  ;;  %v266_v54 = vld [vmem:[%s3651_s1 + $0x740] sm:$0xff]  ;;  %v268_v55 = vld [vmem:[%s3651_s1 + $0x750] sm:$0xff] }
  0x5f   :  { %587 = vmatpush1.msra.mxu0 %v62_v56  ;;  %658 = vmatpush1.msra.mxu1 %v64_v57  ;;  %v255_v56 = vld [vmem:[%s3651_s1 + $0x6e8] sm:$0xff]  ;;  %v257_v57 = vld [vmem:[%s3651_s1 + $0x6f8] sm:$0xff] }
  0x60   :  { %588 = vmatprep.subr.mxu0 %v51_v58  ;;  %659 = vmatprep.subr.mxu1 %v53_v59  ;;  %v254_v58 = vld [vmem:[%s3651_s1 + $0x6e0] sm:$0xff]  ;;  %v256_v59 = vld [vmem:[%s3651_s1 + $0x6f0] sm:$0xff] }
  0x61   :  { %589 = vmatpush1.msra.mxu0 %v50_v60  ;;  %660 = vmatpush1.msra.mxu1 %v52_v61  ;;  %v243_v60 = vld [vmem:[%s3651_s1 + $0x688] sm:$0xff]  ;;  %v245_v61 = vld [vmem:[%s3651_s1 + $0x698] sm:$0xff] }
  0x62   :  { %590 = vmatprep.subr.mxu0 %v39_v62  ;;  %661 = vmatprep.subr.mxu1 %v41_v63  ;;  %v242_v62 = vld [vmem:[%s3651_s1 + $0x680] sm:$0xff]  ;;  %v244_v63 = vld [vmem:[%s3651_s1 + $0x690] sm:$0xff] }
  0x63   :  { %591 = vmatpush1.msra.mxu0 %v38_v2  ;;  %662 = vmatpush1.msra.mxu1 %v40_v3  ;;  %v231_v2 = vld [vmem:[%s3651_s1 + $0x628] sm:$0xff]  ;;  %v233_v3 = vld [vmem:[%s3651_s1 + $0x638] sm:$0xff] }
  0x64   :  { %592 = vmatprep.subr.mxu0 %v411_v4  ;;  %663 = vmatprep.subr.mxu1 %v413_v5  ;;  %v230_v4 = vld [vmem:[%s3651_s1 + $0x620] sm:$0xff]  ;;  %v232_v5 = vld [vmem:[%s3651_s1 + $0x630] sm:$0xff] }
  0x65   :  { %593 = vmatpush2.msra.mxu0 %v410_v6  ;;  %664 = vmatpush2.msra.mxu1 %v412_v7  ;;  %v223_v6 = vld [vmem:[%s3651_s1 + $0x5e8] sm:$0xff]  ;;  %v225_v7 = vld [vmem:[%s3651_s1 + $0x5f8] sm:$0xff] }
  0x66   :  { %594 = vmatprep.subr.mxu0 %v399_v8  ;;  %665 = vmatprep.subr.mxu1 %v401_v9  ;;  %v222_v8 = vld [vmem:[%s3651_s1 + $0x5e0] sm:$0xff]  ;;  %v224_v9 = vld [vmem:[%s3651_s1 + $0x5f0] sm:$0xff] }
  0x67   :  { %595 = vmatpush2.msra.mxu0 %v398_v10  ;;  %666 = vmatpush2.msra.mxu1 %v400_v11  ;;  %v211_v10 = vld [vmem:[%s3651_s1 + $0x588] sm:$0xff]  ;;  %v210_v11 = vld [vmem:[%s3651_s1 + $0x580] sm:$0xff] }
  0x68   :  { %596 = vmatprep.subr.mxu0 %v387_v12  ;;  %667 = vmatprep.subr.mxu1 %v389_v13  ;;  %v212_v12 = vld [vmem:[%s3651_s1 + $0x590] sm:$0xff]  ;;  %v201_v13 = vld [vmem:[%s3651_s1 + $0x538] sm:$0xff] }
  0x69   :  { %597 = vmatpush2.msra.mxu0 %v386_v14  ;;  %668 = vmatpush2.msra.mxu1 %v388_v15  ;;  %v198_v14 = vld [vmem:[%s3651_s1 + $0x520] sm:$0xff]  ;;  %v200_v15 = vld [vmem:[%s3651_s1 + $0x530] sm:$0xff] }
  0x6a   :  { %598 = vmatprep.subr.mxu0 %v375_v16  ;;  %669 = vmatprep.subr.mxu1 %v377_v17  ;;  %v187_v16 = vld [vmem:[%s3651_s1 + $0x4c8] sm:$0xff]  ;;  %v189_v17 = vld [vmem:[%s3651_s1 + $0x4d8] sm:$0xff] }
  0x6b   :  { %599 = vmatpush2.msra.mxu0 %v374_v18  ;;  %670 = vmatpush2.msra.mxu1 %v376_v19  ;;  %v186_v18 = vld [vmem:[%s3651_s1 + $0x4c0] sm:$0xff]  ;;  %v188_v19 = vld [vmem:[%s3651_s1 + $0x4d0] sm:$0xff] }
  0x6c   :  { %600 = vmatprep.subr.mxu0 %v363_v20  ;;  %671 = vmatprep.subr.mxu1 %v365_v21  ;;  %v175_v20 = vld [vmem:[%s3651_s1 + $0x468] sm:$0xff]  ;;  %v177_v21 = vld [vmem:[%s3651_s1 + $0x478] sm:$0xff] }
  0x6d   :  { %601 = vmatpush2.msra.mxu0 %v362_v22  ;;  %672 = vmatpush2.msra.mxu1 %v364_v23  ;;  %v174_v22 = vld [vmem:[%s3651_s1 + $0x460] sm:$0xff]  ;;  %v176_v23 = vld [vmem:[%s3651_s1 + $0x470] sm:$0xff] }
  0x6e   :  { %602 = vmatprep.subr.mxu0 %v351_v24  ;;  %673 = vmatprep.subr.mxu1 %v353_v25  ;;  %v163_v24 = vld [vmem:[%s3651_s1 + $0x408] sm:$0xff]  ;;  %v165_v25 = vld [vmem:[%s3651_s1 + $0x418] sm:$0xff] }
  0x6f   :  { %603 = vmatpush2.msra.mxu0 %v350_v26  ;;  %674 = vmatpush2.msra.mxu1 %v352_v27  ;;  %v162_v26 = vld [vmem:[%s3651_s1 + $0x400] sm:$0xff]  ;;  %v164_v27 = vld [vmem:[%s3651_s1 + $0x410] sm:$0xff] }
  0x70   :  { %604 = vmatprep.subr.mxu0 %v339_v28  ;;  %675 = vmatprep.subr.mxu1 %v341_v29  ;;  %v151_v28 = vld [vmem:[%s3651_s1 + $0x3a8] sm:$0xff]  ;;  %v153_v29 = vld [vmem:[%s3651_s1 + $0x3b8] sm:$0xff] }
  0x71   :  { %605 = vmatpush2.msra.mxu0 %v338_v30  ;;  %676 = vmatpush2.msra.mxu1 %v340_v31  ;;  %v150_v30 = vld [vmem:[%s3651_s1 + $0x3a0] sm:$0xff]  ;;  %v152_v31 = vld [vmem:[%s3651_s1 + $0x3b0] sm:$0xff] }
  0x72   :  { %606 = vmatprep.subr.mxu0 %v327_v32  ;;  %677 = vmatprep.subr.mxu1 %v329_v33  ;;  %v139_v32 = vld [vmem:[%s3651_s1 + $0x348] sm:$0xff]  ;;  %v141_v33 = vld [vmem:[%s3651_s1 + $0x358] sm:$0xff] }
  0x73   :  { %607 = vmatpush2.msra.mxu0 %v326_v34  ;;  %678 = vmatpush2.msra.mxu1 %v328_v35  ;;  %v138_v34 = vld [vmem:[%s3651_s1 + $0x340] sm:$0xff]  ;;  %v140_v35 = vld [vmem:[%s3651_s1 + $0x350] sm:$0xff] }
  0x74   :  { %608 = vmatprep.subr.mxu0 %v315_v36  ;;  %679 = vmatprep.subr.mxu1 %v317_v37  ;;  %v127_v36 = vld [vmem:[%s3651_s1 + $0x2e8] sm:$0xff]  ;;  %v129_v37 = vld [vmem:[%s3651_s1 + $0x2f8] sm:$0xff] }
  0x75   :  { %609 = vmatpush2.msra.mxu0 %v314_v38  ;;  %680 = vmatpush2.msra.mxu1 %v316_v39  ;;  %v126_v38 = vld [vmem:[%s3651_s1 + $0x2e0] sm:$0xff]  ;;  %v128_v39 = vld [vmem:[%s3651_s1 + $0x2f0] sm:$0xff] }
  0x76   :  { %610 = vmatprep.subr.mxu0 %v303_v40  ;;  %681 = vmatprep.subr.mxu1 %v305_v41  ;;  %v115_v40 = vld [vmem:[%s3651_s1 + $0x288] sm:$0xff]  ;;  %v117_v41 = vld [vmem:[%s3651_s1 + $0x298] sm:$0xff] }
  0x77   :  { %611 = vmatpush2.msra.mxu0 %v302_v42  ;;  %682 = vmatpush2.msra.mxu1 %v304_v43  ;;  %v114_v42 = vld [vmem:[%s3651_s1 + $0x280] sm:$0xff]  ;;  %v116_v43 = vld [vmem:[%s3651_s1 + $0x290] sm:$0xff] }
  0x78   :  { %612 = vmatprep.subr.mxu0 %v291_v44  ;;  %683 = vmatprep.subr.mxu1 %v293_v45  ;;  %v103_v44 = vld [vmem:[%s3651_s1 + $0x228] sm:$0xff]  ;;  %v105_v45 = vld [vmem:[%s3651_s1 + $0x238] sm:$0xff] }
  0x79   :  { %613 = vmatpush2.msra.mxu0 %v290_v46  ;;  %684 = vmatpush2.msra.mxu1 %v292_v47  ;;  %v102_v46 = vld [vmem:[%s3651_s1 + $0x220] sm:$0xff]  ;;  %v104_v47 = vld [vmem:[%s3651_s1 + $0x230] sm:$0xff] }
  0x7a   :  { %614 = vmatprep.subr.mxu0 %v279_v48  ;;  %685 = vmatprep.subr.mxu1 %v281_v49  ;;  %v91_v48 = vld [vmem:[%s3651_s1 + $0x1c8] sm:$0xff]  ;;  %v93_v49 = vld [vmem:[%s3651_s1 + $0x1d8] sm:$0xff] }
  0x7b   :  { %615 = vmatpush2.msra.mxu0 %v278_v50  ;;  %686 = vmatpush2.msra.mxu1 %v280_v51  ;;  %v90_v50 = vld [vmem:[%s3651_s1 + $0x1c0] sm:$0xff]  ;;  %v92_v51 = vld [vmem:[%s3651_s1 + $0x1d0] sm:$0xff] }
  0x7c   :  { %616 = vmatprep.subr.mxu0 %v267_v52  ;;  %687 = vmatprep.subr.mxu1 %v269_v53  ;;  %v79_v52 = vld [vmem:[%s3651_s1 + $0x168] sm:$0xff]  ;;  %v81_v53 = vld [vmem:[%s3651_s1 + $0x178] sm:$0xff] }
  0x7d   :  { %617 = vmatpush2.msra.mxu0 %v266_v54  ;;  %688 = vmatpush2.msra.mxu1 %v268_v55  ;;  %v78_v54 = vld [vmem:[%s3651_s1 + $0x160] sm:$0xff]  ;;  %v80_v55 = vld [vmem:[%s3651_s1 + $0x170] sm:$0xff] }
  0x7e   :  { %618 = vmatprep.subr.mxu0 %v255_v56  ;;  %689 = vmatprep.subr.mxu1 %v257_v57  ;;  %v67_v56 = vld [vmem:[%s3651_s1 + $0x108] sm:$0xff]  ;;  %v69_v57 = vld [vmem:[%s3651_s1 + $0x118] sm:$0xff] }
  0x7f   :  { %619 = vmatpush2.msra.mxu0 %v254_v58  ;;  %690 = vmatpush2.msra.mxu1 %v256_v59  ;;  %v66_v58 = vld [vmem:[%s3651_s1 + $0x100] sm:$0xff]  ;;  %v68_v59 = vld [vmem:[%s3651_s1 + $0x110] sm:$0xff] }
  0x80   :  { %620 = vmatprep.subr.mxu0 %v243_v60  ;;  %691 = vmatprep.subr.mxu1 %v245_v61  ;;  %v55_v60 = vld [vmem:[%s3651_s1 + $0xa8] sm:$0xff]  ;;  %v57_v61 = vld [vmem:[%s3651_s1 + $0xb8] sm:$0xff] }
  0x81   :  { %621 = vmatpush2.msra.mxu0 %v242_v62  ;;  %692 = vmatpush2.msra.mxu1 %v244_v63  ;;  %v54_v62 = vld [vmem:[%s3651_s1 + $0xa0] sm:$0xff]  ;;  %v56_v63 = vld [vmem:[%s3651_s1 + $0xb0] sm:$0xff] }
  0x82   :  { %622 = vmatprep.subr.mxu0 %v231_v2  ;;  %693 = vmatprep.subr.mxu1 %v233_v3  ;;  %v43_v2 = vld [vmem:[%s3651_s1 + $0x48] sm:$0xff]  ;;  %v45_v3 = vld [vmem:[%s3651_s1 + $0x58] sm:$0xff] }
  0x83   :  { %623 = vmatpush2.msra.mxu0 %v230_v4  ;;  %624 = vmatprep.mubr.f32.mxu0 %v2123_v0  ;;  %v42_v4 = vld [vmem:[%s3651_s1 + $0x40] sm:$0xff] }
  0x84   :  { %694 = vmatpush2.msra.mxu1 %v232_v5  ;;  %695 = vmatprep.mubr.f32.mxu1 %v2123_v0  ;;  %v213_v0 = vld [vmem:[%s3651_s1 + $0x598] sm:$0xff]  ;;  %v44_v5 = vld [vmem:[%s3651_s1 + $0x50] sm:$0xff] }
  0x85   :  { %625 = vmatmul.mubr.f32.vlgmr.msra.gmra.mxu0 %v2128_v1  ;;  %696 = vmatmul.mubr.f32.vlgmr.msra.gmra.mxu1 %v2128_v1  ;;  %v199_v1 = vld [vmem:[%s3651_s1 + $0x528] sm:$0xff] }
  0x86   :  { %702 = vmatprep.subr.mxu0 %v223_v6  ;;  %773 = vmatprep.subr.mxu1 %v225_v7  ;;  %v415_v6 = vld [vmem:[%s3651_s1 + $0xbe8] sm:$0xff]  ;;  %v417_v7 = vld [vmem:[%s3651_s1 + $0xbf8] sm:$0xff] }
  0x87   :  { %703 = vmatpush1.msra.mxu0 %v222_v8  ;;  %774 = vmatpush1.msra.mxu1 %v224_v9  ;;  %v414_v8 = vld [vmem:[%s3651_s1 + $0xbe0] sm:$0xff]  ;;  %v416_v9 = vld [vmem:[%s3651_s1 + $0xbf0] sm:$0xff] }
  0x88   :  { %704 = vmatprep.subr.mxu0 %v211_v10  ;;  %775 = vmatprep.subr.mxu1 %v213_v0  ;;  %v403_v10 = vld [vmem:[%s3651_s1 + $0xb88] sm:$0xff]  ;;  %v405_v0 = vld [vmem:[%s3651_s1 + $0xb98] sm:$0xff] }
  0x89   :  { %705 = vmatpush1.msra.mxu0 %v210_v11  ;;  %776 = vmatpush1.msra.mxu1 %v212_v12  ;;  %v402_v11 = vld [vmem:[%s3651_s1 + $0xb80] sm:$0xff]  ;;  %v404_v12 = vld [vmem:[%s3651_s1 + $0xb90] sm:$0xff] }
  0x8a   :  { %706 = vmatprep.subr.mxu0 %v199_v1  ;;  %777 = vmatprep.subr.mxu1 %v201_v13  ;;  %v391_v1 = vld [vmem:[%s3651_s1 + $0xb28] sm:$0xff]  ;;  %v393_v13 = vld [vmem:[%s3651_s1 + $0xb38] sm:$0xff] }
  0x8b   :  { %707 = vmatpush1.msra.mxu0 %v198_v14  ;;  %778 = vmatpush1.msra.mxu1 %v200_v15  ;;  %v390_v14 = vld [vmem:[%s3651_s1 + $0xb20] sm:$0xff]  ;;  %v392_v15 = vld [vmem:[%s3651_s1 + $0xb30] sm:$0xff] }
  0x8c   :  { %708 = vmatprep.subr.mxu0 %v187_v16  ;;  %779 = vmatprep.subr.mxu1 %v189_v17  ;;  %v379_v16 = vld [vmem:[%s3651_s1 + $0xac8] sm:$0xff]  ;;  %v381_v17 = vld [vmem:[%s3651_s1 + $0xad8] sm:$0xff] }
  0x8d   :  { %709 = vmatpush1.msra.mxu0 %v186_v18  ;;  %780 = vmatpush1.msra.mxu1 %v188_v19  ;;  %v378_v18 = vld [vmem:[%s3651_s1 + $0xac0] sm:$0xff]  ;;  %v380_v19 = vld [vmem:[%s3651_s1 + $0xad0] sm:$0xff] }
  0x8e   :  { %710 = vmatprep.subr.mxu0 %v175_v20  ;;  %781 = vmatprep.subr.mxu1 %v177_v21  ;;  %v367_v20 = vld [vmem:[%s3651_s1 + $0xa68] sm:$0xff]  ;;  %v369_v21 = vld [vmem:[%s3651_s1 + $0xa78] sm:$0xff] }
  0x8f   :  { %711 = vmatpush1.msra.mxu0 %v174_v22  ;;  %782 = vmatpush1.msra.mxu1 %v176_v23  ;;  %v366_v22 = vld [vmem:[%s3651_s1 + $0xa60] sm:$0xff]  ;;  %v368_v23 = vld [vmem:[%s3651_s1 + $0xa70] sm:$0xff] }
  0x90   :  { %712 = vmatprep.subr.mxu0 %v163_v24  ;;  %783 = vmatprep.subr.mxu1 %v165_v25  ;;  %v355_v24 = vld [vmem:[%s3651_s1 + $0xa08] sm:$0xff]  ;;  %v357_v25 = vld [vmem:[%s3651_s1 + $0xa18] sm:$0xff] }
  0x91   :  { %713 = vmatpush1.msra.mxu0 %v162_v26  ;;  %784 = vmatpush1.msra.mxu1 %v164_v27  ;;  %v354_v26 = vld [vmem:[%s3651_s1 + $0xa00] sm:$0xff]  ;;  %v356_v27 = vld [vmem:[%s3651_s1 + $0xa10] sm:$0xff] }
  0x92   :  { %714 = vmatprep.subr.mxu0 %v151_v28  ;;  %785 = vmatprep.subr.mxu1 %v153_v29  ;;  %v343_v28 = vld [vmem:[%s3651_s1 + $0x9a8] sm:$0xff]  ;;  %v345_v29 = vld [vmem:[%s3651_s1 + $0x9b8] sm:$0xff] }
  0x93   :  { %715 = vmatpush1.msra.mxu0 %v150_v30  ;;  %786 = vmatpush1.msra.mxu1 %v152_v31  ;;  %v342_v30 = vld [vmem:[%s3651_s1 + $0x9a0] sm:$0xff]  ;;  %v344_v31 = vld [vmem:[%s3651_s1 + $0x9b0] sm:$0xff] }
  0x94   :  { %716 = vmatprep.subr.mxu0 %v139_v32  ;;  %787 = vmatprep.subr.mxu1 %v141_v33  ;;  %v331_v32 = vld [vmem:[%s3651_s1 + $0x948] sm:$0xff]  ;;  %v333_v33 = vld [vmem:[%s3651_s1 + $0x958] sm:$0xff] }
  0x95   :  { %717 = vmatpush1.msra.mxu0 %v138_v34  ;;  %788 = vmatpush1.msra.mxu1 %v140_v35  ;;  %v330_v34 = vld [vmem:[%s3651_s1 + $0x940] sm:$0xff]  ;;  %v332_v35 = vld [vmem:[%s3651_s1 + $0x950] sm:$0xff] }
  0x96   :  { %718 = vmatprep.subr.mxu0 %v127_v36  ;;  %789 = vmatprep.subr.mxu1 %v129_v37  ;;  %v319_v36 = vld [vmem:[%s3651_s1 + $0x8e8] sm:$0xff]  ;;  %v321_v37 = vld [vmem:[%s3651_s1 + $0x8f8] sm:$0xff] }
  0x97   :  { %719 = vmatpush1.msra.mxu0 %v126_v38  ;;  %790 = vmatpush1.msra.mxu1 %v128_v39  ;;  %v318_v38 = vld [vmem:[%s3651_s1 + $0x8e0] sm:$0xff]  ;;  %v320_v39 = vld [vmem:[%s3651_s1 + $0x8f0] sm:$0xff] }
  0x98   :  { %720 = vmatprep.subr.mxu0 %v115_v40  ;;  %791 = vmatprep.subr.mxu1 %v117_v41  ;;  %v307_v40 = vld [vmem:[%s3651_s1 + $0x888] sm:$0xff]  ;;  %v309_v41 = vld [vmem:[%s3651_s1 + $0x898] sm:$0xff] }
  0x99   :  { %721 = vmatpush1.msra.mxu0 %v114_v42  ;;  %792 = vmatpush1.msra.mxu1 %v116_v43  ;;  %v306_v42 = vld [vmem:[%s3651_s1 + $0x880] sm:$0xff]  ;;  %v308_v43 = vld [vmem:[%s3651_s1 + $0x890] sm:$0xff] }
  0x9a   :  { %722 = vmatprep.subr.mxu0 %v103_v44  ;;  %793 = vmatprep.subr.mxu1 %v105_v45  ;;  %v295_v44 = vld [vmem:[%s3651_s1 + $0x828] sm:$0xff]  ;;  %v297_v45 = vld [vmem:[%s3651_s1 + $0x838] sm:$0xff] }
  0x9b   :  { %723 = vmatpush1.msra.mxu0 %v102_v46  ;;  %794 = vmatpush1.msra.mxu1 %v104_v47  ;;  %v294_v46 = vld [vmem:[%s3651_s1 + $0x820] sm:$0xff]  ;;  %v296_v47 = vld [vmem:[%s3651_s1 + $0x830] sm:$0xff] }
  0x9c   :  { %724 = vmatprep.subr.mxu0 %v91_v48  ;;  %795 = vmatprep.subr.mxu1 %v93_v49  ;;  %v283_v48 = vld [vmem:[%s3651_s1 + $0x7c8] sm:$0xff]  ;;  %v285_v49 = vld [vmem:[%s3651_s1 + $0x7d8] sm:$0xff] }
  0x9d   :  { %725 = vmatpush1.msra.mxu0 %v90_v50  ;;  %796 = vmatpush1.msra.mxu1 %v92_v51  ;;  %v282_v50 = vld [vmem:[%s3651_s1 + $0x7c0] sm:$0xff]  ;;  %v284_v51 = vld [vmem:[%s3651_s1 + $0x7d0] sm:$0xff] }
  0x9e   :  { %726 = vmatprep.subr.mxu0 %v79_v52  ;;  %797 = vmatprep.subr.mxu1 %v81_v53  ;;  %v271_v52 = vld [vmem:[%s3651_s1 + $0x768] sm:$0xff]  ;;  %v273_v53 = vld [vmem:[%s3651_s1 + $0x778] sm:$0xff] }
  0x9f   :  { %727 = vmatpush1.msra.mxu0 %v78_v54  ;;  %798 = vmatpush1.msra.mxu1 %v80_v55  ;;  %v270_v54 = vld [vmem:[%s3651_s1 + $0x760] sm:$0xff]  ;;  %v272_v55 = vld [vmem:[%s3651_s1 + $0x770] sm:$0xff] }
  0xa0   :  { %728 = vmatprep.subr.mxu0 %v67_v56  ;;  %799 = vmatprep.subr.mxu1 %v69_v57  ;;  %v259_v56 = vld [vmem:[%s3651_s1 + $0x708] sm:$0xff]  ;;  %v261_v57 = vld [vmem:[%s3651_s1 + $0x718] sm:$0xff] }
  0xa1   :  { %729 = vmatpush1.msra.mxu0 %v66_v58  ;;  %800 = vmatpush1.msra.mxu1 %v68_v59  ;;  %v258_v58 = vld [vmem:[%s3651_s1 + $0x700] sm:$0xff]  ;;  %v260_v59 = vld [vmem:[%s3651_s1 + $0x710] sm:$0xff] }
  0xa2   :  { %730 = vmatprep.subr.mxu0 %v55_v60  ;;  %801 = vmatprep.subr.mxu1 %v57_v61  ;;  %v247_v60 = vld [vmem:[%s3651_s1 + $0x6a8] sm:$0xff]  ;;  %v249_v61 = vld [vmem:[%s3651_s1 + $0x6b8] sm:$0xff] }
  0xa3   :  { %731 = vmatpush1.msra.mxu0 %v54_v62  ;;  %802 = vmatpush1.msra.mxu1 %v56_v63  ;;  %v246_v62 = vld [vmem:[%s3651_s1 + $0x6a0] sm:$0xff]  ;;  %v248_v63 = vld [vmem:[%s3651_s1 + $0x6b0] sm:$0xff] }
  0xa4   :  { %732 = vmatprep.subr.mxu0 %v43_v2  ;;  %803 = vmatprep.subr.mxu1 %v45_v3  ;;  %v235_v2 = vld [vmem:[%s3651_s1 + $0x648] sm:$0xff]  ;;  %v237_v3 = vld [vmem:[%s3651_s1 + $0x658] sm:$0xff] }
  0xa5   :  { %733 = vmatpush1.msra.mxu0 %v42_v4  ;;  %804 = vmatpush1.msra.mxu1 %v44_v5  ;;  %v234_v4 = vld [vmem:[%s3651_s1 + $0x640] sm:$0xff]  ;;  %v236_v5 = vld [vmem:[%s3651_s1 + $0x650] sm:$0xff] }
  0xa6   :  { %734 = vmatprep.subr.mxu0 %v415_v6  ;;  %805 = vmatprep.subr.mxu1 %v417_v7  ;;  %v1682_v6 = vld [vmem:[%s3652_s0 + $0x8] sm:$0xff]  ;;  %v1683_v7 = vld [vmem:[%s3652_s0] sm:$0xff] }
  0xa7   :  { %735 = vmatpush2.msra.mxu0 %v414_v8  ;;  %806 = vmatpush2.msra.mxu1 %v416_v9  ;;  %v937_v8 = vld [vmem:[%s3653_s3 + $0x1e8] sm:$0xff]  ;;  %v936_v9 = vld [vmem:[%s3653_s3 + $0x1e0] sm:$0xff] }
  0xa8   :  { %736 = vmatprep.subr.mxu0 %v403_v10  ;;  %807 = vmatprep.subr.mxu1 %v405_v0  ;;  %v933_v10 = vld [vmem:[%s3653_s3 + $0x1c8] sm:$0xff]  ;;  %v932_v0 = vld [vmem:[%s3653_s3 + $0x1c0] sm:$0xff] }
  0xa9   :  { %737 = vmatpush2.msra.mxu0 %v402_v11  ;;  %808 = vmatpush2.msra.mxu1 %v404_v12  ;;  %v929_v11 = vld [vmem:[%s3653_s3 + $0x1a8] sm:$0xff]  ;;  %v928_v12 = vld [vmem:[%s3653_s3 + $0x1a0] sm:$0xff] }
  0xaa   :  { %738 = vmatprep.subr.mxu0 %v391_v1  ;;  %809 = vmatprep.subr.mxu1 %v393_v13  ;;  %v925_v1 = vld [vmem:[%s3653_s3 + $0x188] sm:$0xff]  ;;  %v924_v13 = vld [vmem:[%s3653_s3 + $0x180] sm:$0xff] }
  0xab   :  { %739 = vmatpush2.msra.mxu0 %v390_v14  ;;  %810 = vmatpush2.msra.mxu1 %v392_v15  ;;  %v921_v14 = vld [vmem:[%s3653_s3 + $0x168] sm:$0xff]  ;;  %v920_v15 = vld [vmem:[%s3653_s3 + $0x160] sm:$0xff] }
  0xac   :  { %740 = vmatprep.subr.mxu0 %v379_v16  ;;  %811 = vmatprep.subr.mxu1 %v381_v17  ;;  %v917_v16 = vld [vmem:[%s3653_s3 + $0x148] sm:$0xff]  ;;  %v916_v17 = vld [vmem:[%s3653_s3 + $0x140] sm:$0xff] }
  0xad   :  { %741 = vmatpush2.msra.mxu0 %v378_v18  ;;  %812 = vmatpush2.msra.mxu1 %v380_v19  ;;  %v913_v18 = vld [vmem:[%s3653_s3 + $0x128] sm:$0xff]  ;;  %v912_v19 = vld [vmem:[%s3653_s3 + $0x120] sm:$0xff] }
  0xae   :  { %742 = vmatprep.subr.mxu0 %v367_v20  ;;  %813 = vmatprep.subr.mxu1 %v369_v21  ;;  %v1065_v20 = vld [vmem:[%s3653_s3 + $0x5e8] sm:$0xff]  ;;  %v1064_v21 = vld [vmem:[%s3653_s3 + $0x5e0] sm:$0xff] }
  0xaf   :  { %743 = vmatpush2.msra.mxu0 %v366_v22  ;;  %814 = vmatpush2.msra.mxu1 %v368_v23  ;;  %v909_v22 = vld [vmem:[%s3653_s3 + $0x108] sm:$0xff] }
  0xb0   :  { %744 = vmatprep.subr.mxu0 %v355_v24  ;;  %815 = vmatprep.subr.mxu1 %v357_v25  ;;  %v1061_v23 = vld [vmem:[%s3653_s3 + $0x5c8] sm:$0xff]  ;;  %v908_v24 = vld [vmem:[%s3653_s3 + $0x100] sm:$0xff] }
  0xb1   :  { %745 = vmatpush2.msra.mxu0 %v354_v26  ;;  %816 = vmatpush2.msra.mxu1 %v356_v27  ;;  %v1060_v25 = vld [vmem:[%s3653_s3 + $0x5c0] sm:$0xff]  ;;  %v1057_v26 = vld [vmem:[%s3653_s3 + $0x5a8] sm:$0xff] }
  0xb2   :  { %746 = vmatprep.subr.mxu0 %v343_v28  ;;  %817 = vmatprep.subr.mxu1 %v345_v29  ;;  %v905_v27 = vld [vmem:[%s3653_s3 + $0xe8] sm:$0xff]  ;;  %v1056_v28 = vld [vmem:[%s3653_s3 + $0x5a0] sm:$0xff] }
  0xb3   :  { %747 = vmatpush2.msra.mxu0 %v342_v30  ;;  %818 = vmatpush2.msra.mxu1 %v344_v31  ;;  %v904_v29 = vld [vmem:[%s3653_s3 + $0xe0] sm:$0xff]  ;;  %v1053_v30 = vld [vmem:[%s3653_s3 + $0x588] sm:$0xff] }
  0xb4   :  { %748 = vmatprep.subr.mxu0 %v331_v32  ;;  %819 = vmatprep.subr.mxu1 %v333_v33  ;;  %v901_v31 = vld [vmem:[%s3653_s3 + $0xc8] sm:$0xff]  ;;  %v1052_v32 = vld [vmem:[%s3653_s3 + $0x580] sm:$0xff] }
  0xb5   :  { %749 = vmatpush2.msra.mxu0 %v330_v34  ;;  %820 = vmatpush2.msra.mxu1 %v332_v35  ;;  %v900_v33 = vld [vmem:[%s3653_s3 + $0xc0] sm:$0xff]  ;;  %v1049_v34 = vld [vmem:[%s3653_s3 + $0x568] sm:$0xff] }
  0xb6   :  { %750 = vmatprep.subr.mxu0 %v319_v36  ;;  %821 = vmatprep.subr.mxu1 %v321_v37  ;;  %v897_v35 = vld [vmem:[%s3653_s3 + $0xa8] sm:$0xff]  ;;  %v1048_v36 = vld [vmem:[%s3653_s3 + $0x560] sm:$0xff] }
  0xb7   :  { %751 = vmatpush2.msra.mxu0 %v318_v38  ;;  %822 = vmatpush2.msra.mxu1 %v320_v39  ;;  %v896_v37 = vld [vmem:[%s3653_s3 + $0xa0] sm:$0xff]  ;;  %v1045_v38 = vld [vmem:[%s3653_s3 + $0x548] sm:$0xff] }
  0xb8   :  { %752 = vmatprep.subr.mxu0 %v307_v40  ;;  %823 = vmatprep.subr.mxu1 %v309_v41  ;;  %v893_v39 = vld [vmem:[%s3653_s3 + $0x88] sm:$0xff]  ;;  %v1044_v40 = vld [vmem:[%s3653_s3 + $0x540] sm:$0xff] }
  0xb9   :  { %753 = vmatpush2.msra.mxu0 %v306_v42  ;;  %824 = vmatpush2.msra.mxu1 %v308_v43  ;;  %v892_v41 = vld [vmem:[%s3653_s3 + $0x80] sm:$0xff]  ;;  %v1041_v42 = vld [vmem:[%s3653_s3 + $0x528] sm:$0xff] }
  0xba   :  { %754 = vmatprep.subr.mxu0 %v295_v44  ;;  %825 = vmatprep.subr.mxu1 %v297_v45  ;;  %v889_v43 = vld [vmem:[%s3653_s3 + $0x68] sm:$0xff]  ;;  %v1040_v44 = vld [vmem:[%s3653_s3 + $0x520] sm:$0xff] }
  0xbb   :  { %755 = vmatpush2.msra.mxu0 %v294_v46  ;;  %826 = vmatpush2.msra.mxu1 %v296_v47  ;;  %v888_v45 = vld [vmem:[%s3653_s3 + $0x60] sm:$0xff]  ;;  %v1037_v46 = vld [vmem:[%s3653_s3 + $0x508] sm:$0xff] }
  0xbc   :  { %756 = vmatprep.subr.mxu0 %v283_v48  ;;  %827 = vmatprep.subr.mxu1 %v285_v49  ;;  %v885_v47 = vld [vmem:[%s3653_s3 + $0x48] sm:$0xff]  ;;  %v1036_v48 = vld [vmem:[%s3653_s3 + $0x500] sm:$0xff] }
  0xbd   :  { %757 = vmatpush2.msra.mxu0 %v282_v50  ;;  %828 = vmatpush2.msra.mxu1 %v284_v51  ;;  %v884_v49 = vld [vmem:[%s3653_s3 + $0x40] sm:$0xff]  ;;  %v1033_v50 = vld [vmem:[%s3653_s3 + $0x4e8] sm:$0xff] }
  0xbe   :  { %758 = vmatprep.subr.mxu0 %v271_v52  ;;  %829 = vmatprep.subr.mxu1 %v273_v53  ;;  %v881_v51 = vld [vmem:[%s3653_s3 + $0x28] sm:$0xff]  ;;  %v1032_v52 = vld [vmem:[%s3653_s3 + $0x4e0] sm:$0xff] }
  0xbf   :  { %759 = vmatpush2.msra.mxu0 %v270_v54  ;;  %830 = vmatpush2.msra.mxu1 %v272_v55  ;;  %v880_v53 = vld [vmem:[%s3653_s3 + $0x20] sm:$0xff]  ;;  %v1029_v54 = vld [vmem:[%s3653_s3 + $0x4c8] sm:$0xff] }
  0xc0   :  { %760 = vmatprep.subr.mxu0 %v259_v56  ;;  %831 = vmatprep.subr.mxu1 %v261_v57  ;;  %v877_v55 = vld [vmem:[%s3653_s3 + $0x8] sm:$0xff]  ;;  %v1028_v56 = vld [vmem:[%s3653_s3 + $0x4c0] sm:$0xff] }
  0xc1   :  { %761 = vmatpush2.msra.mxu0 %v258_v58  ;;  %832 = vmatpush2.msra.mxu1 %v260_v59  ;;  %v876_v57 = vld [vmem:[%s3653_s3] sm:$0xff]  ;;  %v1025_v58 = vld [vmem:[%s3653_s3 + $0x4a8] sm:$0xff] }
  0xc2   :  { %762 = vmatprep.subr.mxu0 %v247_v60  ;;  %833 = vmatprep.subr.mxu1 %v249_v61  ;;  %v1001_v59 = vld [vmem:[%s3653_s3 + $0x3e8] sm:$0xff]  ;;  %v1024_v60 = vld [vmem:[%s3653_s3 + $0x4a0] sm:$0xff] }
  0xc3   :  { %763 = vmatpush2.msra.mxu0 %v246_v62  ;;  %834 = vmatpush2.msra.mxu1 %v248_v63  ;;  %v1000_v61 = vld [vmem:[%s3653_s3 + $0x3e0] sm:$0xff]  ;;  %v997_v62 = vld [vmem:[%s3653_s3 + $0x3c8] sm:$0xff] }
  0xc4   :  { %764 = vmatprep.subr.mxu0 %v235_v2  ;;  %835 = vmatprep.subr.mxu1 %v237_v3  ;;  %v996_v63 = vld [vmem:[%s3653_s3 + $0x3c0] sm:$0xff]  ;;  %v993_v2 = vld [vmem:[%s3653_s3 + $0x3a8] sm:$0xff] }
  0xc5   :  { %765 = vmatpush2.msra.mxu0 %v234_v4  ;;  %766 = vmatprep.mubr.f32.mxu0 %v1682_v6  ;;  %v992_v3 = vld [vmem:[%s3653_s3 + $0x3a0] sm:$0xff]  ;;  %v989_v4 = vld [vmem:[%s3653_s3 + $0x388] sm:$0xff] }
  0xc6   :  { %836 = vmatpush2.msra.mxu1 %v236_v5  ;;  %837 = vmatprep.mubr.f32.mxu1 %v1682_v6  ;;  %v988_v5 = vld [vmem:[%s3653_s3 + $0x380] sm:$0xff]  ;;  %v985_v6 = vld [vmem:[%s3653_s3 + $0x368] sm:$0xff] }
  0xc7   :  { %767 = vmatmul.mubr.f32.vlgmr.msra.gmra.mxu0 %v1683_v7  ;;  %838 = vmatmul.mubr.f32.vlgmr.msra.gmra.mxu1 %v1683_v7  ;;  %v984_v7 = vld [vmem:[%s3653_s3 + $0x360] sm:$0xff] }
  0xc8   :  { %1068 = vmatprep.subr.mxu0 %v937_v8  ;;  %1139 = vmatprep.subr.mxu1 %v1065_v20  ;;  %v981_v8 = vld [vmem:[%s3653_s3 + $0x348] sm:$0xff]  ;;  %v956_v20 = vld [vmem:[%s3653_s3 + $0x280] sm:$0xff] }
  0xc9   :  { %1069 = vmatpush1.msra.mxu0 %v936_v9  ;;  %1140 = vmatpush1.msra.mxu1 %v1064_v21  ;;  %v980_v9 = vld [vmem:[%s3653_s3 + $0x340] sm:$0xff] }
  0xca   :  { %1070 = vmatprep.subr.mxu0 %v933_v10  ;;  %1141 = vmatprep.subr.mxu1 %v1061_v23  ;;  %v977_v10 = vld [vmem:[%s3653_s3 + $0x328] sm:$0xff]  ;;  %v1020_v21 = vld [vmem:[%s3653_s3 + $0x480] sm:$0xff] }
  0xcb   :  { %1071 = vmatpush1.msra.mxu0 %v932_v0  ;;  %1142 = vmatpush1.msra.mxu1 %v1060_v25  ;;  %v976_v0 = vld [vmem:[%s3653_s3 + $0x320] sm:$0xff]  ;;  %v1017_v23 = vld [vmem:[%s3653_s3 + $0x468] sm:$0xff] }
  0xcc   :  { %1072 = vmatprep.subr.mxu0 %v929_v11  ;;  %1143 = vmatprep.subr.mxu1 %v1057_v26  ;;  %v973_v11 = vld [vmem:[%s3653_s3 + $0x308] sm:$0xff]  ;;  %v1016_v25 = vld [vmem:[%s3653_s3 + $0x460] sm:$0xff] }
  0xcd   :  { %1073 = vmatpush1.msra.mxu0 %v928_v12  ;;  %1144 = vmatpush1.msra.mxu1 %v1056_v28  ;;  %v972_v12 = vld [vmem:[%s3653_s3 + $0x300] sm:$0xff]  ;;  %v949_v26 = vld [vmem:[%s3653_s3 + $0x248] sm:$0xff] }
  0xce   :  { %1074 = vmatprep.subr.mxu0 %v925_v1  ;;  %1145 = vmatprep.subr.mxu1 %v1053_v30  ;;  %v969_v1 = vld [vmem:[%s3653_s3 + $0x2e8] sm:$0xff]  ;;  %v948_v28 = vld [vmem:[%s3653_s3 + $0x240] sm:$0xff] }
  0xcf   :  { %1075 = vmatpush1.msra.mxu0 %v924_v13  ;;  %1146 = vmatpush1.msra.mxu1 %v1052_v32  ;;  %v968_v13 = vld [vmem:[%s3653_s3 + $0x2e0] sm:$0xff]  ;;  %v945_v30 = vld [vmem:[%s3653_s3 + $0x228] sm:$0xff] }
  0xd0   :  { %1076 = vmatprep.subr.mxu0 %v921_v14  ;;  %1147 = vmatprep.subr.mxu1 %v1049_v34  ;;  %v965_v14 = vld [vmem:[%s3653_s3 + $0x2c8] sm:$0xff]  ;;  %v944_v32 = vld [vmem:[%s3653_s3 + $0x220] sm:$0xff] }
  0xd1   :  { %1077 = vmatpush1.msra.mxu0 %v920_v15  ;;  %1148 = vmatpush1.msra.mxu1 %v1048_v36  ;;  %v964_v15 = vld [vmem:[%s3653_s3 + $0x2c0] sm:$0xff]  ;;  %v941_v34 = vld [vmem:[%s3653_s3 + $0x208] sm:$0xff] }
  0xd2   :  { %1078 = vmatprep.subr.mxu0 %v917_v16  ;;  %1149 = vmatprep.subr.mxu1 %v1045_v38  ;;  %v961_v16 = vld [vmem:[%s3653_s3 + $0x2a8] sm:$0xff]  ;;  %v940_v36 = vld [vmem:[%s3653_s3 + $0x200] sm:$0xff]  ;;  %v939_v38 = vld [vmem:[%s3653_s3 + $0x1f8] sm:$0xff] }
  0xd3   :  { %1079 = vmatpush1.msra.mxu0 %v916_v17  ;;  %1150 = vmatpush1.msra.mxu1 %v1044_v40  ;;  %v960_v17 = vld [vmem:[%s3653_s3 + $0x2a0] sm:$0xff]  ;;  %v1684_v40 = vmov 0.0  }
  0xd4   :  { %1080 = vmatprep.subr.mxu0 %v913_v18  ;;  %1151 = vmatprep.subr.mxu1 %v1041_v42  ;;  %v957_v18 = vld [vmem:[%s3653_s3 + $0x288] sm:$0xff] }
  0xd5   :  { %1081 = vmatpush1.msra.mxu0 %v912_v19  ;;  %1152 = vmatpush1.msra.mxu1 %v1040_v44  ;;  %v1021_v19 = vld [vmem:[%s3653_s3 + $0x488] sm:$0xff] }
  0xd6   :  { %1082 = vmatprep.subr.mxu0 %v909_v22  ;;  %1153 = vmatprep.subr.mxu1 %v1037_v46  ;;  %v953_v22 = vld [vmem:[%s3653_s3 + $0x268] sm:$0xff] }
  0xd7   :  { %1083 = vmatpush1.msra.mxu0 %v908_v24  ;;  %1154 = vmatpush1.msra.mxu1 %v1036_v48  ;;  %v952_v24 = vld [vmem:[%s3653_s3 + $0x260] sm:$0xff] }
  0xd8   :  { %1084 = vmatprep.subr.mxu0 %v905_v27  ;;  %1155 = vmatprep.subr.mxu1 %v1033_v50  ;;  %v1013_v27 = vld [vmem:[%s3653_s3 + $0x448] sm:$0xff] }
  0xd9   :  { %1085 = vmatpush1.msra.mxu0 %v904_v29  ;;  %1156 = vmatpush1.msra.mxu1 %v1032_v52  ;;  %v1012_v29 = vld [vmem:[%s3653_s3 + $0x440] sm:$0xff] }
  0xda   :  { %1086 = vmatprep.subr.mxu0 %v901_v31  ;;  %1157 = vmatprep.subr.mxu1 %v1029_v54  ;;  %v1009_v31 = vld [vmem:[%s3653_s3 + $0x428] sm:$0xff]  ;;  %v853_v52 = vld [vmem:[%s3654_s2] sm:$0x7] }
  0xdb   :  { %1087 = vmatpush1.msra.mxu0 %v900_v33  ;;  %1158 = vmatpush1.msra.mxu1 %v1028_v56  ;;  %v1008_v33 = vld [vmem:[%s3653_s3 + $0x420] sm:$0xff] }
  0xdc   :  { %1088 = vmatprep.subr.mxu0 %v897_v35  ;;  %1159 = vmatprep.subr.mxu1 %v1025_v58  ;;  %v1005_v35 = vld [vmem:[%s3653_s3 + $0x408] sm:$0xff] }
  0xdd   :  { %1089 = vmatpush1.msra.mxu0 %v896_v37  ;;  %1160 = vmatpush1.msra.mxu1 %v1024_v60  ;;  %v1004_v37 = vld [vmem:[%s3653_s3 + $0x400] sm:$0xff] }
  0xde   :  { %1090 = vmatprep.subr.mxu0 %v893_v39  ;;  %1161 = vmatprep.subr.mxu1 %v1021_v19  ;;  %v1067_v39 = vld [vmem:[%s3653_s3 + $0x5f8] sm:$0xff] }
  0xdf   :  { %1091 = vmatpush1.msra.mxu0 %v892_v41  ;;  %1162 = vmatpush1.msra.mxu1 %v1020_v21  ;;  %v931_v19 = vld [vmem:[%s3653_s3 + $0x1b8] sm:$0xff]  ;;  %v930_v21 = vld [vmem:[%s3653_s3 + $0x1b0] sm:$0xff] }
  0xe0   :  { %1092 = vmatprep.subr.mxu0 %v889_v43  ;;  %1163 = vmatprep.subr.mxu1 %v1017_v23  ;;  %v855_v43 = vlaneseq  ;;  %v927_v23 = vld [vmem:[%s3653_s3 + $0x198] sm:$0xff] }
  0xe1   :  { %1093 = vmatpush1.msra.mxu0 %v888_v45  ;;  %1164 = vmatpush1.msra.mxu1 %v1016_v25  ;;  %v926_v25 = vld [vmem:[%s3653_s3 + $0x190] sm:$0xff] }
  0xe2   :  { %1094 = vmatprep.subr.mxu0 %v885_v47  ;;  %1165 = vmatprep.subr.mxu1 %v1013_v27  ;;  %v856_v46 = vshrl.u32 %v855_v43, 7  ;;  %v923_v27 = vld [vmem:[%s3653_s3 + $0x178] sm:$0xff] }
  0xe3   :  { %1095 = vmatpush1.msra.mxu0 %v884_v49  ;;  %1166 = vmatpush1.msra.mxu1 %v1012_v29  ;;  %v922_v29 = vld [vmem:[%s3653_s3 + $0x170] sm:$0xff] }
  0xe4   :  { %1096 = vmatprep.subr.mxu0 %v881_v51  ;;  %1167 = vmatprep.subr.mxu1 %v1009_v31  ;;  %v861_v49 = vsub.s32 1, %v856_v46  ;;  %v865_v54 = vsub.s32 2, %v856_v46  ;;  %v919_v31 = vld [vmem:[%s3653_s3 + $0x158] sm:$0xff] }
  0xe5   :  { %1097 = vmatpush1.msra.mxu0 %v880_v53  ;;  %1168 = vmatpush1.msra.mxu1 %v1008_v33  ;;  %v857_v53 = vsub.s32 0, %v856_v46  ;;  %v918_v33 = vld [vmem:[%s3653_s3 + $0x150] sm:$0xff]  ;;  %v1035_v46 = vld [vmem:[%s3653_s3 + $0x4f8] sm:$0xff] }
  0xe6   :  { %1098 = vmatprep.subr.mxu0 %v877_v55  ;;  %1169 = vmatprep.subr.mxu1 %v1005_v35  ;;  %v915_v35 = vld [vmem:[%s3653_s3 + $0x138] sm:$0xff] }
  0xe7   :  { %1099 = vmatpush1.msra.mxu0 %v876_v57  ;;  %1170 = vmatpush1.msra.mxu1 %v1004_v37  ;;  %v914_v37 = vld [vmem:[%s3653_s3 + $0x130] sm:$0xff] }
  0xe8   :  { %1100 = vmatprep.subr.mxu0 %v1001_v59  ;;  %1203 = vmatprep.mubr.f32.mxu1 %v1684_v40  ;;  %v862_v59 = vrot.slane %v853_v52, %v861_v49  ;;  %v903_v49 = vld [vmem:[%s3653_s3 + $0xd8] sm:$0xff] }
  0xe9   :  { %1101 = vmatpush2.msra.mxu0 %v1000_v61  ;;  %1210 = vmatprep.subr.mxu1 %v939_v38  ;;  %v1042_v38 = vld [vmem:[%s3653_s3 + $0x530] sm:$0xff] }
  0xea   :  { %1102 = vmatprep.subr.mxu0 %v997_v62  ;;  %v858_v62 = vrot.slane %v853_v52, %v857_v53  ;;  %v899_v53 = vld [vmem:[%s3653_s3 + $0xb8] sm:$0xff] }
  0xeb   :  { %1103 = vmatpush2.msra.mxu0 %v996_v63 }
  0xec   :  { %1104 = vmatprep.subr.mxu0 %v993_v2  ;;  %v866_v2 = vrot.slane %v853_v52, %v865_v54  ;;  %v1030_v52 = vld [vmem:[%s3653_s3 + $0x4d0] sm:$0xff]  ;;  %v1027_v54 = vld [vmem:[%s3653_s3 + $0x4b8] sm:$0xff] }
  0xed   :  { %1105 = vmatpush2.msra.mxu0 %v992_v3 }
  0xee   :  { %1106 = vmatprep.subr.mxu0 %v989_v4 }
  0xef   :  { %1107 = vmatpush2.msra.mxu0 %v988_v5 }
  0xf0   :  { %1108 = vmatprep.subr.mxu0 %v985_v6 }
  0xf1   :  { %1109 = vmatpush2.msra.mxu0 %v984_v7 }
  0xf2   :  { %1110 = vmatprep.subr.mxu0 %v981_v8 }
  0xf3   :  { %1111 = vmatpush2.msra.mxu0 %v980_v9 }
  0xf4   :  { %1112 = vmatprep.subr.mxu0 %v977_v10 }
  0xf5   :  { %1113 = vmatpush2.msra.mxu0 %v976_v0 }
  0xf6   :  { %1114 = vmatprep.subr.mxu0 %v973_v11 }
  0xf7   :  { %1115 = vmatpush2.msra.mxu0 %v972_v12 }
  0xf8   :  { %1116 = vmatprep.subr.mxu0 %v969_v1 }
  0xf9   :  { %1117 = vmatpush2.msra.mxu0 %v968_v13  ;;  %v938_v13 = vld [vmem:[%s3653_s3 + $0x1f0] sm:$0xff] }
  0xfa   :  { %1118 = vmatprep.subr.mxu0 %v965_v14  ;;  %v1066_v14 = vld [vmem:[%s3653_s3 + $0x5f0] sm:$0xff] }
  0xfb   :  { %1119 = vmatpush2.msra.mxu0 %v964_v15  ;;  %v935_v15 = vld [vmem:[%s3653_s3 + $0x1d8] sm:$0xff] }
  0xfc   :  { %1120 = vmatprep.subr.mxu0 %v961_v16  ;;  %v1063_v16 = vld [vmem:[%s3653_s3 + $0x5d8] sm:$0xff] }
  0xfd   :  { %1121 = vmatpush2.msra.mxu0 %v960_v17  ;;  %v934_v17 = vld [vmem:[%s3653_s3 + $0x1d0] sm:$0xff] }
  0xfe   :  { %1122 = vmatprep.subr.mxu0 %v957_v18  ;;  %v1062_v18 = vld [vmem:[%s3653_s3 + $0x5d0] sm:$0xff] }
  0xff   :  { %1123 = vmatpush2.msra.mxu0 %v956_v20  ;;  %v1059_v20 = vld [vmem:[%s3653_s3 + $0x5b8] sm:$0xff] }
 0x100   :  { %1124 = vmatprep.subr.mxu0 %v953_v22  ;;  %v1058_v22 = vld [vmem:[%s3653_s3 + $0x5b0] sm:$0xff] }
 0x101   :  { %1125 = vmatpush2.msra.mxu0 %v952_v24  ;;  %v1055_v24 = vld [vmem:[%s3653_s3 + $0x598] sm:$0xff] }
 0x102   :  { %1126 = vmatprep.subr.mxu0 %v949_v26  ;;  %v1054_v26 = vld [vmem:[%s3653_s3 + $0x590] sm:$0xff] }
 0x103   :  { %1127 = vmatpush2.msra.mxu0 %v948_v28  ;;  %v555_v41 = vpop.f32.mrf.mxu1  ;;  %v1051_v28 = vld [vmem:[%s3653_s3 + $0x578] sm:$0xff] }
 0x104   :  { %1128 = vmatprep.subr.mxu0 %v945_v30  ;;  %v484_v42 = vpop.f32.mrf.mxu0  ;;  %v1050_v30 = vld [vmem:[%s3653_s3 + $0x570] sm:$0xff] }
 0x105   :  { %1129 = vmatpush2.msra.mxu0 %v944_v32  ;;  %v557_v44 = vpop.f32.mrf.mxu1  ;;  %v1047_v32 = vld [vmem:[%s3653_s3 + $0x558] sm:$0xff] }
 0x106   :  { %1130 = vmatprep.subr.mxu0 %v941_v34  ;;  %v486_v45 = vpop.f32.mrf.mxu0  ;;  %v844_v60 = vmax.f32 %v484_v42, %v557_v44  ;;  %v1046_v34 = vld [vmem:[%s3653_s3 + $0x550] sm:$0xff] }
 0x107   :  { %1131 = vmatpush2.msra.mxu0 %v940_v36  ;;  %v1043_v36 = vld [vmem:[%s3653_s3 + $0x538] sm:$0xff]  ;;  %v910_v42 = vld [vmem:[%s3653_s3 + $0x110] sm:$0xff] }
 0x108   :  { %1281 = vmatprep.subr.mxu0 %v1067_v39  ;;  %v911_v39 = vld [vmem:[%s3653_s3 + $0x118] sm:$0xff]  ;;  %v1038_v44 = vld [vmem:[%s3653_s3 + $0x510] sm:$0xff] }
 0x145   :  { %v626_v47 = vpop.f32.mrf.mxu0  ;;  %v697_v48 = vpop.f32.mrf.mxu1 }
 0x146   :  { %v845_v57 = vmax.f32 %v486_v45, %v626_v47  ;;  %v907_v45 = vld [vmem:[%s3653_s3 + $0xf8] sm:$0xff]  ;;  %v906_v47 = vld [vmem:[%s3653_s3 + $0xf0] sm:$0xff] }
 0x147   :  { %v628_v50 = vpop.f32.mrf.mxu0  ;;  %v699_v51 = vpop.f32.mrf.mxu1 }
 0x148   :  { %v846_v3 = vmax.f32 %v555_v41, %v628_v50  ;;  %v1039_v41 = vld [vmem:[%s3653_s3 + $0x518] sm:$0xff] }
 0x149   :  { %v1031_v50 = vld [vmem:[%s3653_s3 + $0x4d8] sm:$0xff] }
 0x187   :  { %v768_v55 = vpop.f32.mrf.mxu0  ;;  %v839_v56 = vpop.f32.mrf.mxu1 }
 0x188   :  { %v848_v58 = vmax.f32 %v699_v51, %v839_v56  ;;  %v902_v51 = vld [vmem:[%s3653_s3 + $0xd0] sm:$0xff] }
 0x189   :  { %v770_v61 = vpop.f32.mrf.mxu0  ;;  %v841_v63 = vpop.f32.mrf.mxu1  ;;  %v1026_v56 = vld [vmem:[%s3653_s3 + $0x4b0] sm:$0xff] }
 0x18a   :  { %v851_v4 = vmax.f32 %v845_v57, %v848_v58  ;;  %v847_v5 = vmax.f32 %v697_v48, %v770_v61  ;;  %v849_v6 = vmax.f32 %v768_v55, %v841_v63  ;;  %v1034_v48 = vld [vmem:[%s3653_s3 + $0x4f0] sm:$0xff]  ;;  %v895_v57 = vld [vmem:[%s3653_s3 + $0x98] sm:$0xff] }
 0x18b   :  { %v898_v55 = vld [vmem:[%s3653_s3 + $0xb0] sm:$0xff]  ;;  %v1023_v58 = vld [vmem:[%s3653_s3 + $0x498] sm:$0xff] }
 0x18c   :  { %v850_v7 = vmax.f32 %v844_v60, %v847_v5  ;;  %v852_v8 = vmax.f32 %v846_v3, %v849_v6  ;;  %v871_v9 = vadd.f32 %v862_v59, %v851_v4  ;;  %v894_v59 = vld [vmem:[%s3653_s3 + $0x90] sm:$0xff]  ;;  %v891_v61 = vld [vmem:[%s3653_s3 + $0x78] sm:$0xff] }
 0x18d   :  { %v1022_v60 = vld [vmem:[%s3653_s3 + $0x490] sm:$0xff]  ;;  %v887_v3 = vld [vmem:[%s3653_s3 + $0x58] sm:$0xff] }
 0x18e   :  { %v3211_v10 = vadd.f32 %v858_v62, %v850_v7  ;;  %v3213_v0 = vadd.f32 %v866_v2, %v852_v8  ;;  %v874_v11 = vmax.f32 %v871_v9, 0.0  ;;  %v1019_v62 = vld [vmem:[%s3653_s3 + $0x478] sm:$0xff]  ;;  %v890_v63 = vld [vmem:[%s3653_s3 + $0x70] sm:$0xff] }
 0x18f   :  { %v1018_v2 = vld [vmem:[%s3653_s3 + $0x470] sm:$0xff]  ;;  %v1015_v4 = vld [vmem:[%s3653_s3 + $0x458] sm:$0xff] }
 0x190   :  { %v873_v12 = vmax.f32 %v3211_v10, 0.0  ;;  %v875_v1 = vmax.f32 %v3213_v0, 0.0  ;;  %1132 = vmatprep.mubr.f32.mxu0 %v874_v11  ;;  %v886_v5 = vld [vmem:[%s3653_s3 + $0x50] sm:$0xff]  ;;  %v883_v7 = vld [vmem:[%s3653_s3 + $0x38] sm:$0xff]  ;;  %v1376_v10 = vld [vmem:[%s3655_s5 + $0x60] sm:$0xff] }
 0x191   :  { %v1014_v6 = vld [vmem:[%s3653_s3 + $0x450] sm:$0xff]  ;;  %v1011_v8 = vld [vmem:[%s3653_s3 + $0x438] sm:$0xff] }
 0x192   :  { %1133 = vmatmul.mubr.f32.vlgmr.msra.gmra.mxu0 %v873_v12  ;;  %1204 = vmatmul.mubr.f32.vlgmr.msra.gmra.mxu1 %v875_v1  ;;  %v882_v9 = vld [vmem:[%s3653_s3 + $0x30] sm:$0xff]  ;;  %v991_v0 = vld [vmem:[%s3653_s3 + $0x398] sm:$0xff] }
 0x193   :  { %1211 = vmatpush1.msra.mxu1 %v938_v13  ;;  %1282 = vmatpush1.msra.mxu0 %v1066_v14  ;;  %v879_v13 = vld [vmem:[%s3653_s3 + $0x18] sm:$0xff] }
 0x194   :  { %1212 = vmatprep.subr.mxu1 %v935_v15  ;;  %1274 = vmatprep.mubr.f32.mxu1 %v874_v11  ;;  %v1010_v11 = vld [vmem:[%s3653_s3 + $0x430] sm:$0xff]  ;;  %v1007_v14 = vld [vmem:[%s3653_s3 + $0x418] sm:$0xff] }
 0x195   :  { %1283 = vmatprep.subr.mxu0 %v1063_v16  ;;  %1213 = vmatpush1.msra.mxu1 %v934_v17  ;;  %v878_v15 = vld [vmem:[%s3653_s3 + $0x10] sm:$0xff]  ;;  %v1003_v17 = vld [vmem:[%s3653_s3 + $0x3f8] sm:$0xff] }
 0x196   :  { %1284 = vmatpush1.msra.mxu0 %v1062_v18  ;;  %1214 = vmatprep.subr.mxu1 %v931_v19  ;;  %v1006_v16 = vld [vmem:[%s3653_s3 + $0x410] sm:$0xff]  ;;  %v999_v19 = vld [vmem:[%s3653_s3 + $0x3d8] sm:$0xff] }
 0x197   :  { %1285 = vmatprep.subr.mxu0 %v1059_v20  ;;  %1215 = vmatpush1.msra.mxu1 %v930_v21  ;;  %v1002_v18 = vld [vmem:[%s3653_s3 + $0x3f0] sm:$0xff]  ;;  %v995_v21 = vld [vmem:[%s3653_s3 + $0x3b8] sm:$0xff] }
 0x198   :  { %1286 = vmatpush1.msra.mxu0 %v1058_v22  ;;  %1216 = vmatprep.subr.mxu1 %v927_v23  ;;  %v998_v20 = vld [vmem:[%s3653_s3 + $0x3d0] sm:$0xff]  ;;  %v987_v23 = vld [vmem:[%s3653_s3 + $0x378] sm:$0xff] }
 0x199   :  { %1287 = vmatprep.subr.mxu0 %v1055_v24  ;;  %1217 = vmatpush1.msra.mxu1 %v926_v25  ;;  %v994_v22 = vld [vmem:[%s3653_s3 + $0x3b0] sm:$0xff]  ;;  %v983_v25 = vld [vmem:[%s3653_s3 + $0x358] sm:$0xff] }
 0x19a   :  { %1288 = vmatpush1.msra.mxu0 %v1054_v26  ;;  %1218 = vmatprep.subr.mxu1 %v923_v27  ;;  %v986_v24 = vld [vmem:[%s3653_s3 + $0x370] sm:$0xff]  ;;  %v979_v27 = vld [vmem:[%s3653_s3 + $0x338] sm:$0xff] }
 0x19b   :  { %1289 = vmatprep.subr.mxu0 %v1051_v28  ;;  %1219 = vmatpush1.msra.mxu1 %v922_v29  ;;  %v982_v26 = vld [vmem:[%s3653_s3 + $0x350] sm:$0xff]  ;;  %v975_v29 = vld [vmem:[%s3653_s3 + $0x318] sm:$0xff] }
 0x19c   :  { %1290 = vmatpush1.msra.mxu0 %v1050_v30  ;;  %1220 = vmatprep.subr.mxu1 %v919_v31  ;;  %v978_v28 = vld [vmem:[%s3653_s3 + $0x330] sm:$0xff]  ;;  %v971_v31 = vld [vmem:[%s3653_s3 + $0x2f8] sm:$0xff] }
 0x19d   :  { %1291 = vmatprep.subr.mxu0 %v1047_v32  ;;  %1221 = vmatpush1.msra.mxu1 %v918_v33  ;;  %v974_v30 = vld [vmem:[%s3653_s3 + $0x310] sm:$0xff]  ;;  %v967_v33 = vld [vmem:[%s3653_s3 + $0x2d8] sm:$0xff] }
 0x19e   :  { %1292 = vmatpush1.msra.mxu0 %v1046_v34  ;;  %1222 = vmatprep.subr.mxu1 %v915_v35  ;;  %v970_v32 = vld [vmem:[%s3653_s3 + $0x2f0] sm:$0xff]  ;;  %v963_v35 = vld [vmem:[%s3653_s3 + $0x2b8] sm:$0xff] }
 0x19f   :  { %1293 = vmatprep.subr.mxu0 %v1043_v36  ;;  %1223 = vmatpush1.msra.mxu1 %v914_v37  ;;  %v966_v34 = vld [vmem:[%s3653_s3 + $0x2d0] sm:$0xff]  ;;  %v959_v37 = vld [vmem:[%s3653_s3 + $0x298] sm:$0xff] }
 0x1a0   :  { %1294 = vmatpush1.msra.mxu0 %v1042_v38  ;;  %1224 = vmatprep.subr.mxu1 %v911_v39  ;;  %v962_v36 = vld [vmem:[%s3653_s3 + $0x2b0] sm:$0xff]  ;;  %v955_v39 = vld [vmem:[%s3653_s3 + $0x278] sm:$0xff] }
 0x1a1   :  { %1295 = vmatprep.subr.mxu0 %v1039_v41  ;;  %1225 = vmatpush1.msra.mxu1 %v910_v42  ;;  %v958_v38 = vld [vmem:[%s3653_s3 + $0x290] sm:$0xff]  ;;  %v951_v42 = vld [vmem:[%s3653_s3 + $0x258] sm:$0xff] }
 0x1a2   :  { %1296 = vmatpush1.msra.mxu0 %v1038_v44  ;;  %1226 = vmatprep.subr.mxu1 %v907_v45  ;;  %v954_v41 = vld [vmem:[%s3653_s3 + $0x270] sm:$0xff]  ;;  %v947_v45 = vld [vmem:[%s3653_s3 + $0x238] sm:$0xff] }
 0x1a3   :  { %1297 = vmatprep.subr.mxu0 %v1035_v46  ;;  %1227 = vmatpush1.msra.mxu1 %v906_v47  ;;  %v950_v44 = vld [vmem:[%s3653_s3 + $0x250] sm:$0xff]  ;;  %v943_v47 = vld [vmem:[%s3653_s3 + $0x218] sm:$0xff] }
 0x1a4   :  { %1298 = vmatpush1.msra.mxu0 %v1034_v48  ;;  %1228 = vmatprep.subr.mxu1 %v903_v49  ;;  %v946_v46 = vld [vmem:[%s3653_s3 + $0x230] sm:$0xff]  ;;  %v1379_v49 = vld [vmem:[%s3655_s5 + $0x78] sm:$0xff] }
 0x1a5   :  { %1299 = vmatprep.subr.mxu0 %v1031_v50  ;;  %1229 = vmatpush1.msra.mxu1 %v902_v51  ;;  %v942_v48 = vld [vmem:[%s3653_s3 + $0x210] sm:$0xff]  ;;  %v1377_v51 = vld [vmem:[%s3655_s5 + $0x68] sm:$0xff] }
 0x1a6   :  { %1300 = vmatpush1.msra.mxu0 %v1030_v52  ;;  %1230 = vmatprep.subr.mxu1 %v899_v53  ;;  %v1378_v50 = vld [vmem:[%s3655_s5 + $0x70] sm:$0xff]  ;;  %v1373_v53 = vld [vmem:[%s3655_s5 + $0x48] sm:$0xff] }
 0x1a7   :  { %1301 = vmatprep.subr.mxu0 %v1027_v54  ;;  %1231 = vmatpush1.msra.mxu1 %v898_v55  ;;  %v1374_v52 = vld [vmem:[%s3655_s5 + $0x50] sm:$0xff]  ;;  %v1372_v54 = vld [vmem:[%s3655_s5 + $0x40] sm:$0xff]  ;;  %v1371_v55 = vld [vmem:[%s3655_s5 + $0x38] sm:$0xff] }
 0x1a8   :  { %1302 = vmatpush1.msra.mxu0 %v1026_v56  ;;  %1232 = vmatprep.subr.mxu1 %v895_v57  ;;  %v1370_v56 = vld [vmem:[%s3655_s5 + $0x30] sm:$0xff]  ;;  %v1369_v57 = vld [vmem:[%s3655_s5 + $0x28] sm:$0xff] }
 0x1a9   :  { %1303 = vmatprep.subr.mxu0 %v1023_v58  ;;  %1233 = vmatpush1.msra.mxu1 %v894_v59  ;;  %v1368_v58 = vld [vmem:[%s3655_s5 + $0x20] sm:$0xff]  ;;  %v1367_v59 = vld [vmem:[%s3655_s5 + $0x18] sm:$0xff] }
 0x1aa   :  { %1304 = vmatpush1.msra.mxu0 %v1022_v60  ;;  %1234 = vmatprep.subr.mxu1 %v891_v61  ;;  %v1366_v60 = vld [vmem:[%s3655_s5 + $0x10] sm:$0xff]  ;;  %v1365_v61 = vld [vmem:[%s3655_s5 + $0x8] sm:$0xff] }
 0x1ab   :  { %1305 = vmatprep.subr.mxu0 %v1019_v62  ;;  %1235 = vmatpush1.msra.mxu1 %v890_v63  ;;  %v1364_v62 = vld [vmem:[%s3655_s5] sm:$0xff]  ;;  %v1473_v63 = vld [vmem:[%s3656_s7 + $0x78] sm:$0xff] }
 0x1ac   :  { %1306 = vmatpush1.msra.mxu0 %v1018_v2  ;;  %1236 = vmatprep.subr.mxu1 %v887_v3  ;;  %v1472_v2 = vld [vmem:[%s3656_s7 + $0x70] sm:$0xff]  ;;  %v1471_v3 = vld [vmem:[%s3656_s7 + $0x68] sm:$0xff] }
 0x1ad   :  { %1307 = vmatprep.subr.mxu0 %v1015_v4  ;;  %1237 = vmatpush1.msra.mxu1 %v886_v5  ;;  %v1470_v4 = vld [vmem:[%s3656_s7 + $0x60] sm:$0xff]  ;;  %v1469_v5 = vld [vmem:[%s3656_s7 + $0x58] sm:$0xff] }
 0x1ae   :  { %1308 = vmatpush1.msra.mxu0 %v1014_v6  ;;  %1238 = vmatprep.subr.mxu1 %v883_v7  ;;  %v1468_v6 = vld [vmem:[%s3656_s7 + $0x50] sm:$0xff]  ;;  %v1467_v7 = vld [vmem:[%s3656_s7 + $0x48] sm:$0xff] }
 0x1af   :  { %1309 = vmatprep.subr.mxu0 %v1011_v8  ;;  %1239 = vmatpush1.msra.mxu1 %v882_v9  ;;  %v1466_v8 = vld [vmem:[%s3656_s7 + $0x40] sm:$0xff]  ;;  %v1465_v9 = vld [vmem:[%s3656_s7 + $0x38] sm:$0xff] }
 0x1b0   :  { %1310 = vmatpush1.msra.mxu0 %v1010_v11  ;;  %1240 = vmatprep.subr.mxu1 %v879_v13  ;;  %v1464_v11 = vld [vmem:[%s3656_s7 + $0x30] sm:$0xff]  ;;  %v1463_v13 = vld [vmem:[%s3656_s7 + $0x28] sm:$0xff] }
 0x1b1   :  { %1311 = vmatprep.subr.mxu0 %v1007_v14  ;;  %1241 = vmatpush1.msra.mxu1 %v878_v15  ;;  %v1462_v14 = vld [vmem:[%s3656_s7 + $0x20] sm:$0xff]  ;;  %v1461_v15 = vld [vmem:[%s3656_s7 + $0x18] sm:$0xff] }
 0x1b2   :  { %1312 = vmatpush1.msra.mxu0 %v1006_v16  ;;  %1345 = vmatprep.mubr.f32.mxu0 %v1684_v40 }
 0x1b3   :  { %1242 = vmatprep.subr.mxu1 %v1003_v17  ;;  %1346 = vmatmul.mubr.f32.vlgmr.msra.gmra.mxu0 %v875_v1  ;;  %v990_v1 = vld [vmem:[%s3653_s3 + $0x390] sm:$0xff] }
 0x1b4   :  { %1243 = vmatpush2.msra.mxu1 %v1002_v18  ;;  %1606 = vmatprep.subr.mxu0 %v1684_v40 }
 0x1b5   :  { %1244 = vmatprep.subr.mxu1 %v999_v19  ;;  %1607 = vmatpush3.msra.mxu0 %v1379_v49 }
 0x1b6   :  { %1245 = vmatpush2.msra.mxu1 %v998_v20  ;;  %1608 = vmatprep.subr.mxu0 %v1684_v40 }
 0x1b7   :  { %1246 = vmatprep.subr.mxu1 %v995_v21  ;;  %1609 = vmatpush3.msra.mxu0 %v1378_v50 }
 0x1b8   :  { %1247 = vmatpush2.msra.mxu1 %v994_v22  ;;  %1610 = vmatprep.subr.mxu0 %v1684_v40 }
 0x1b9   :  { %1248 = vmatprep.subr.mxu1 %v991_v0  ;;  %1611 = vmatpush3.msra.mxu0 %v1377_v51 }
 0x1ba   :  { %1249 = vmatpush2.msra.mxu1 %v990_v1  ;;  %1612 = vmatprep.subr.mxu0 %v1684_v40 }
 0x1bb   :  { %1250 = vmatprep.subr.mxu1 %v987_v23  ;;  %1613 = vmatpush3.msra.mxu0 %v1376_v10 }
 0x1bc   :  { %1251 = vmatpush2.msra.mxu1 %v986_v24  ;;  %1614 = vmatprep.subr.mxu0 %v1684_v40 }
 0x1bd   :  { %1252 = vmatprep.subr.mxu1 %v983_v25  ;;  %1638 = vmatprep.mubr.msk.f32.mxu0 %vm1685_vm0, %v1684_v40 }
 0x1be   :  { %1253 = vmatpush2.msra.mxu1 %v982_v26 }
 0x1bf   :  { %1254 = vmatprep.subr.mxu1 %v979_v27 }
 0x1c0   :  { %1255 = vmatpush2.msra.mxu1 %v978_v28  ;;  %v1569_v28 = vld [vmem:[%s3657_s4] ss:$0 sm:$0xff] }
 0x1c1   :  { %1256 = vmatprep.subr.mxu1 %v975_v29 }
 0x1c2   :  { %1257 = vmatpush2.msra.mxu1 %v974_v30 }
 0x1c3   :  { %1258 = vmatprep.subr.mxu1 %v971_v31 }
 0x1c4   :  { %1259 = vmatpush2.msra.mxu1 %v970_v32  ;;  %v1460_v32 = vld [vmem:[%s3656_s7 + $0x10] sm:$0xff] }
 0x1c5   :  { %1260 = vmatprep.subr.mxu1 %v967_v33  ;;  %v1459_v33 = vld [vmem:[%s3656_s7 + $0x8] sm:$0xff] }
 0x1c6   :  { %1261 = vmatpush2.msra.mxu1 %v966_v34  ;;  %v1458_v34 = vld [vmem:[%s3656_s7] sm:$0xff] }
 0x1c7   :  { %1262 = vmatprep.subr.mxu1 %v963_v35  ;;  %v1570_v35 = vld [vmem:[%s3658_s6] ss:$0 sm:$0xff] }
 0x1c8   :  { %1263 = vmatpush2.msra.mxu1 %v962_v36 }
 0x1c9   :  { %1264 = vmatprep.subr.mxu1 %v959_v37 }
 0x1ca   :  { %1265 = vmatpush2.msra.mxu1 %v958_v38 }
 0x1cb   :  { %1266 = vmatprep.subr.mxu1 %v955_v39 }
 0x1cc   :  { %1267 = vmatpush2.msra.mxu1 %v954_v41  ;;  %v1552_v41 = vand.u32 127, %v855_v43 }
 0x1cd   :  { %1268 = vmatprep.subr.mxu1 %v951_v42 }
 0x1ce   :  { %1269 = vmatpush2.msra.mxu1 %v950_v44  ;;  %vm1553_vm1 = vcmp.lt.s32.totalorder %v1552_v41, 10 }
 0x1cf   :  { %1270 = vmatprep.subr.mxu1 %v947_v45 }
 0x1d0   :  { %1271 = vmatpush2.msra.mxu1 %v946_v46 }
 0x1d1   :  { %1272 = vmatprep.subr.mxu1 %v943_v47 }
 0x1d2   :  { %1273 = vmatpush2.msra.mxu1 %v942_v48 }
 0x1d3   :  { %1275 = vmatmul.mubr.f32.vlgmr.msra.gmra.mxu1 %v873_v12  ;;  %1641 = vmatprep.subr.mxu1 %v1684_v40  ;;  %v1375_v12 = vld [vmem:[%s3655_s5 + $0x58] sm:$0xff] }
 0x1d4   :  { %1615 = vmatpush3.msra.mxu0 %v1375_v12  ;;  %1673 = vmatprep.mubr.msk.f32.mxu1 %vm1685_vm0, %v1684_v40 }
 0x1d5   :  { %1616 = vmatprep.subr.mxu0 %v1684_v40  ;;  %1642 = vmatpush3.msra.mxu1 %v1473_v63 }
 0x1d6   :  { %1617 = vmatpush3.msra.mxu0 %v1374_v52  ;;  %1643 = vmatprep.subr.mxu1 %v1684_v40 }
 0x1d7   :  { %1618 = vmatprep.subr.mxu0 %v1684_v40  ;;  %1644 = vmatpush3.msra.mxu1 %v1472_v2 }
 0x1d8   :  { %1619 = vmatpush3.msra.mxu0 %v1373_v53  ;;  %1645 = vmatprep.subr.mxu1 %v1684_v40 }
 0x1d9   :  { %1620 = vmatprep.subr.mxu0 %v1684_v40  ;;  %1646 = vmatpush3.msra.mxu1 %v1471_v3 }
 0x1da   :  { %1621 = vmatpush3.msra.mxu0 %v1372_v54  ;;  %1647 = vmatprep.subr.mxu1 %v1684_v40 }
 0x1db   :  { %1622 = vmatprep.subr.mxu0 %v1684_v40  ;;  %1648 = vmatpush3.msra.mxu1 %v1470_v4 }
 0x1dc   :  { %1623 = vmatpush3.msra.mxu0 %v1371_v55  ;;  %1649 = vmatprep.subr.mxu1 %v1684_v40 }
 0x1dd   :  { %1624 = vmatprep.subr.mxu0 %v1684_v40  ;;  %1650 = vmatpush3.msra.mxu1 %v1469_v5 }
 0x1de   :  { %1625 = vmatpush3.msra.mxu0 %v1370_v56  ;;  %1651 = vmatprep.subr.mxu1 %v1684_v40 }
 0x1df   :  { %1626 = vmatprep.subr.mxu0 %v1684_v40  ;;  %1652 = vmatpush3.msra.mxu1 %v1468_v6 }
 0x1e0   :  { %1627 = vmatpush3.msra.mxu0 %v1369_v57  ;;  %1653 = vmatprep.subr.mxu1 %v1684_v40 }
 0x1e1   :  { %1628 = vmatprep.subr.mxu0 %v1684_v40  ;;  %1654 = vmatpush3.msra.mxu1 %v1467_v7 }
 0x1e2   :  { %1629 = vmatpush3.msra.mxu0 %v1368_v58  ;;  %1655 = vmatprep.subr.mxu1 %v1684_v40 }
 0x1e3   :  { %1630 = vmatprep.subr.mxu0 %v1684_v40  ;;  %1656 = vmatpush3.msra.mxu1 %v1466_v8 }
 0x1e4   :  { %1631 = vmatpush3.msra.mxu0 %v1367_v59  ;;  %1657 = vmatprep.subr.mxu1 %v1684_v40 }
 0x1e5   :  { %1632 = vmatprep.subr.mxu0 %v1684_v40  ;;  %1658 = vmatpush3.msra.mxu1 %v1465_v9 }
 0x1e6   :  { %1633 = vmatpush3.msra.mxu0 %v1366_v60  ;;  %1659 = vmatprep.subr.mxu1 %v1684_v40 }
 0x1e7   :  { %1634 = vmatprep.subr.mxu0 %v1684_v40  ;;  %1660 = vmatpush3.msra.mxu1 %v1464_v11 }
 0x1e8   :  { %1635 = vmatpush3.msra.mxu0 %v1365_v61  ;;  %1661 = vmatprep.subr.mxu1 %v1684_v40 }
 0x1e9   :  { %1636 = vmatprep.subr.mxu0 %v1684_v40  ;;  %1662 = vmatpush3.msra.mxu1 %v1463_v13 }
 0x1ea   :  { %1637 = vmatpush3.msra.mxu0 %v1364_v62  ;;  %1663 = vmatprep.subr.mxu1 %v1684_v40 }
 0x1eb   :  { %1664 = vmatpush3.msra.mxu1 %v1462_v14 }
 0x1ec   :  { %1665 = vmatprep.subr.mxu1 %v1684_v40 }
 0x1ed   :  { %1666 = vmatpush3.msra.mxu1 %v1461_v15 }
 0x1ee   :  { %1667 = vmatprep.subr.mxu1 %v1684_v40 }
 0x1ef   :  { %1668 = vmatpush3.msra.mxu1 %v1460_v32 }
 0x1f0   :  { %1669 = vmatprep.subr.mxu1 %v1684_v40 }
 0x1f1   :  { %1670 = vmatpush3.msra.mxu1 %v1459_v33 }
 0x1f2   :  { %1671 = vmatprep.subr.mxu1 %v1684_v40  ;;  %v1571_v40 = vld [vmem:[%s3659_s8] ss:$0 sm:$0xff] }
 0x1f3   :  { %1672 = vmatpush3.msra.mxu1 %v1458_v34 }
 0x252   :  { %v1134_v16 = vpop.f32.mrf.mxu0  ;;  %v1205_v17 = vpop.f32.mrf.mxu1 }
 0x253   :  { %v1206_v23 = vadd.f32 %v1205_v17, %v1134_v16 }
 0x254   :  { %v1136_v18 = vpop.f32.mrf.mxu0  ;;  %v1207_v19 = vpop.f32.mrf.mxu1 }
 0x255   :  { %v1208_v22 = vadd.f32 %v1207_v19, %v1136_v18 }
 0x257   :  { %v1352_v26 = vmax.f32 %v1206_v23, %v1208_v22 }
 0x273   :  { %v1347_v20 = vpop.f32.mrf.mxu0 }
 0x275   :  { %v1349_v0 = vpop.f32.mrf.mxu0 }
 0x293   :  { %v1276_v21 = vpop.f32.mrf.mxu1 }
 0x294   :  { %v1348_v24 = vadd.f32 %v1347_v20, %v1276_v21 }
 0x295   :  { %v1278_v1 = vpop.f32.mrf.mxu1 }
 0x296   :  { %v1350_v25 = vadd.f32 %v1349_v0, %v1278_v1 }
 0x298   :  { %v1353_v27 = vmax.f32 %v1348_v24, %v1350_v25 }
 0x29a   :  { %v1354_v29 = vmax.f32 %v1352_v26, %v1353_v27 }
 0x29c   :  { %v1362_v30 = vadd.f32 %v1569_v28, %v1354_v29 }
 0x29e   :  { %v1363_v31 = vmax.f32 %v1362_v30, 0.0 }
 0x2a0   :  { %1639 = vmatmul.mubr.f32.vlgmr.msra.gmra.mxu0 %v1363_v31 }
 0x360   :  { %v1453_v36 = vpop.f32.mrf.mxu0 }
 0x361   :  { %v1454_v37 = vadd.f32 %v1570_v35, %v1453_v36 }
 0x362   :  { %v1640_v38 = vpop.f32.mrf.mxu0 }
 0x363   :  { %v1457_v39 = vmax.f32 %v1454_v37, 0.0 }
 0x365   :  { %1674 = vmatmul.mubr.f32.vlgmr.msra.gmra.mxu1 %v1457_v39 }
 0x425   :  { %v1547_v42 = vpop.f32.mrf.mxu1 }
 0x426   :  { %v1548_v44 = vadd.f32 %v1571_v40, %v1547_v42 }
 0x427   :  { %v1675_v45 = vpop.f32.mrf.mxu1 }
 0x428   :  { %v1554_v46 = vsel %vm1553_vm1, %v1548_v44, -1e+30 }
 0x429   :  { %1555 = vmax.xlane.f32.xlu0 %v1554_v46 }
 0x4b2   :  { %v1556_v47 = vpop.xlane.xlu0 %1555 }
 0x4b3   :  { %v1557_v48 = vsub.f32 %v1554_v46, %v1556_v47 }
 0x4b5   :  { %v1558_v49 = vmul.f32 1.442695, %v1557_v48 }
 0x4b7   :  { %1678 = vpow2.f32 %v1558_v49 }
 0x4c4   :  { %v1679_v50 = vpop.eup %1678 }
 0x4c5   :  { %1560 = vadd.xlane.f32.xlu0 %v1679_v50 }
 0x54e   :  { %v1561_v51 = vpop.xlane.xlu0 %1560 }
 0x54f   :  { %1680 = vrcp.f32 %v1561_v51 }
 0x55c   :  { %v1681_v10 = vpop.eup %1680 }
 0x55d   :  { %v1563_v43 = vmul.f32 %v1681_v10, %v1679_v50 }
 0x55f   :  { %1564 = vst [vmem:[%s3660_s9] sm:$0xff] %v1563_v43 }

</bundles_post_ra>
